<compile_context>
chip_gen: v7x
topology: tpu7x:2x2x1
jax: 0.10.0
libtpu: 0.0.40
codegen_flags: <defaults>
</compile_context>

<pallas_src>
import jax
import jax.numpy as jnp
from jax import lax
from jax.experimental import pallas as pl
from jax.experimental.pallas import tpu as pltpu


def _gelu(x):
    # TODO(synk): PyTorch F.gelu defaults to the exact erf formulation; we use
    # the tanh approximation (max abs diff ~1e-3) since erf lowering is not
    # guaranteed in Mosaic.
    c = jnp.float32(0.7978845608028654)  # sqrt(2/pi)
    return 0.5 * x * (1.0 + jnp.tanh(c * (x + 0.044715 * x * x * x)))


def ifno1d_kernel(x_ref, g_ref, pos_ref,
                  fc0_wx, fc0_wg, fc0_b, ln_g, ln_b,
                  wconv_w, wconv_b,
                  fc1_w, fc1_b, fc2_w, fc2_b, fc3_w, fc3_b,
                  fc21_w, fc21_b, fc22_w, fc22_b,
                  out_ref):
    TB, S, D0 = x_ref.shape
    M = pos_ref.shape[1]
    Pin = pos_ref.shape[2]

    # ---- batch-folded shared-weight chain: (TB*S, ·) rows ----------------
    xf = x_ref[...].reshape(TB * S, D0)
    gf = g_ref[...].reshape(TB * S, 1)

    # fc0: Linear(D0+1 -> width), the grid column handled as a rank-1 update
    # (broadcast mul instead of a K=1 MXU pass), then LayerNorm + gelu.
    h = jnp.dot(xf, fc0_wx[...], preferred_element_type=jnp.float32)
    h = h + gf * fc0_wg[...] + fc0_b[...]
    mu = jnp.mean(h, axis=-1, keepdims=True)
    var = jnp.mean((h - mu) * (h - mu), axis=-1, keepdims=True)
    h = (h - mu) * lax.rsqrt(var + jnp.float32(1e-5))
    h = h * ln_g[...] + ln_b[...]
    h = _gelu(h)

    # w0..w3: 1x1 Conv1d == pointwise linear, each followed by relu.
    for k in range(4):
        h = jnp.dot(h, wconv_w[k], preferred_element_type=jnp.float32) + wconv_b[k]
        h = jnp.maximum(h, jnp.float32(0.0))

    # fc1 -> gelu -> fc2 -> gelu     (h2: (TB*S, C))
    h = _gelu(jnp.dot(h, fc1_w[...], preferred_element_type=jnp.float32) + fc1_b[...])
    h2 = _gelu(jnp.dot(h, fc2_w[...], preferred_element_type=jnp.float32) + fc2_b[...])

    # position branch, batch-folded: fc21 -> gelu -> fc22 -> gelu  (TB*M, L)
    pf = pos_ref[...].reshape(TB * M, Pin)
    x2 = _gelu(jnp.dot(pf, fc21_w[...], preferred_element_type=jnp.float32) + fc21_b[...])
    x2 = _gelu(jnp.dot(x2, fc22_w[...], preferred_element_type=jnp.float32) + fc22_b[...])

    # ---- per-batch tail: fc3 over spatial dim + einsum 'ncb,nmb->nmc' -----
    # Static loop over the (small) batch tile; each iteration is a pair of
    # tiny 2-D dot_generals.  Output stored as (C, M): M on the lane axis.
    for bb in range(TB):
        h2_b = h2[bb * S:(bb + 1) * S, :]                       # (S, C)
        x1_b = lax.dot_general(h2_b, fc3_w[...], (((0,), (0,)), ((), ())),
                               preferred_element_type=jnp.float32) + fc3_b[...]
        x1_b = _gelu(x1_b)                                      # (C, L)
        x2_b = x2[bb * M:(bb + 1) * M, :]                       # (M, L)
        out_b = lax.dot_general(x1_b, x2_b, (((1,), (1,)), ((), ())),
                                preferred_element_type=jnp.float32)   # (C, M)
        out_ref[bb] = out_b.astype(out_ref.dtype)


def _const_spec(arr):
    if arr.ndim == 2:
        return pl.BlockSpec(arr.shape, lambda b: (0, 0))
    elif arr.ndim == 3:
        return pl.BlockSpec(arr.shape, lambda b: (0, 0, 0))
    raise ValueError("unsupported weight rank")


def _pick_batch_tile(B, S, target_rows=512):
    """Largest divisor of B such that the folded row dim TB*S stays modest."""
    tb = max(1, min(B, target_rows // max(S, 1)))
    while B % tb != 0:
        tb -= 1
    return tb


def ifno1d_forward(x, grid, position, params, *, batch_tile=None):
    B, S, D0 = x.shape
    M, Pin = position.shape[1], position.shape[2]
    C = params["fc2_w"].shape[1]

    TB = batch_tile if batch_tile is not None else _pick_batch_tile(B, S)
    assert B % TB == 0, "batch tile must divide batch size"

    weight_names = ["fc0_wx", "fc0_wg", "fc0_b", "ln_g", "ln_b",
                    "wconv_w", "wconv_b",
                    "fc1_w", "fc1_b", "fc2_w", "fc2_b", "fc3_w", "fc3_b",
                    "fc21_w", "fc21_b", "fc22_w", "fc22_b"]
    weights = [params[n] for n in weight_names]

    in_specs = [
        pl.BlockSpec((TB, S, D0), lambda b: (b, 0, 0)),
        pl.BlockSpec((TB, S, 1), lambda b: (b, 0, 0)),
        pl.BlockSpec((TB, M, Pin), lambda b: (b, 0, 0)),
    ] + [_const_spec(w) for w in weights]

    out_cm = pl.pallas_call(
        ifno1d_kernel,
        out_shape=jax.ShapeDtypeStruct((B, C, M), jnp.float32),
        grid_spec=pltpu.PrefetchScalarGridSpec(
            num_scalar_prefetch=0,
            grid=(B // TB,),
            in_specs=in_specs,
            out_specs=pl.BlockSpec((TB, C, M), lambda b: (b, 0, 0)),
        ),
        compiler_params=pltpu.CompilerParams(
            dimension_semantics=("parallel",)),
    )(x, grid, position, *weights)

    # Back to the PyTorch output layout (B, M, C); tiny transpose in XLA.
    return jnp.transpose(out_cm, (0, 2, 1))


def init_params(key, input_channel, spatial, blength,
                num_channels=1, width=32, initial_step=10, hidden1=128):
    d0 = initial_step * num_channels
    ks = jax.random.split(key, 15)
    f32 = jnp.float32

    def nrm(k, shape, scale=0.02):
        return (scale * jax.random.normal(k, shape)).astype(f32)

    # All weights stored pre-transposed to (in_features, out_features).
    return {
        "fc0_wx": nrm(ks[0], (d0, width)),        # fc0 weight rows for x
        "fc0_wg": nrm(ks[14], (1, width)),        # fc0 weight row for the grid coord
        "fc0_b": nrm(ks[1], (1, width)),
        "ln_g": jnp.ones((1, width), f32),
        "ln_b": jnp.zeros((1, width), f32),
        "wconv_w": nrm(ks[2], (4, width, width)),  # w0..w3 (1x1 convs) stacked
        "wconv_b": nrm(ks[3], (4, 1, width)),
        "fc1_w": nrm(ks[4], (width, hidden1)),
        "fc1_b": nrm(ks[5], (1, hidden1)),
        "fc2_w": nrm(ks[6], (hidden1, num_channels)),
        "fc2_b": nrm(ks[7], (1, num_channels)),
        "fc3_w": nrm(ks[8], (spatial, blength)),
        "fc3_b": nrm(ks[9], (1, blength)),
        "fc21_w": nrm(ks[10], (input_channel, blength)),
        "fc21_b": nrm(ks[11], (1, blength)),
        "fc22_w": nrm(ks[12], (blength, blength)),
        "fc22_b": nrm(ks[13], (1, blength)),
    }


if __name__ == "__main__":
    B, S, M = 2, 16, 12
    initial_step, num_channels = 10, 1
    input_channel = 3
    blength = 8
    width = 32

    key = jax.random.PRNGKey(0)
    kx, kp_pos, kparams = jax.random.split(key, 3)

    x = jax.random.normal(kx, (B, S, initial_step * num_channels), jnp.float32)
    grid_coords = jnp.tile(
        jnp.linspace(0.0, 1.0, S, dtype=jnp.float32)[None, :, None], (B, 1, 1))
    position = jax.random.normal(kp_pos, (B, M, input_channel), jnp.float32)

    params = init_params(kparams, input_channel, S, blength,
                         num_channels=num_channels, width=width,
                         initial_step=initial_step)

    out = ifno1d_forward(x, grid_coords, position, params)
    out = jax.block_until_ready(out)
    assert out.shape == (B, M, num_channels)
    assert bool(jnp.all(jnp.isfinite(out)))
    print("KERNEL_OK")
</pallas_src>

<mosaic_0001>
module attributes {stable_mosaic.version = 11 : i64} {
  func.func @ifno1d_kernel(%arg0: i32, %arg1: memref<2x16x10xf32, #tpu.memory_space<vmem>>, %arg2: memref<2x16x1xf32, #tpu.memory_space<vmem>>, %arg3: memref<2x12x3xf32, #tpu.memory_space<vmem>>, %arg4: memref<10x32xf32, #tpu.memory_space<vmem>>, %arg5: memref<1x32xf32, #tpu.memory_space<vmem>>, %arg6: memref<1x32xf32, #tpu.memory_space<vmem>>, %arg7: memref<1x32xf32, #tpu.memory_space<vmem>>, %arg8: memref<1x32xf32, #tpu.memory_space<vmem>>, %arg9: memref<4x32x32xf32, #tpu.memory_space<vmem>>, %arg10: memref<4x1x32xf32, #tpu.memory_space<vmem>>, %arg11: memref<32x128xf32, #tpu.memory_space<vmem>>, %arg12: memref<1x128xf32, #tpu.memory_space<vmem>>, %arg13: memref<128x1xf32, #tpu.memory_space<vmem>>, %arg14: memref<1x1xf32, #tpu.memory_space<vmem>>, %arg15: memref<16x8xf32, #tpu.memory_space<vmem>>, %arg16: memref<1x8xf32, #tpu.memory_space<vmem>>, %arg17: memref<3x8xf32, #tpu.memory_space<vmem>>, %arg18: memref<1x8xf32, #tpu.memory_space<vmem>>, %arg19: memref<8x8xf32, #tpu.memory_space<vmem>>, %arg20: memref<1x8xf32, #tpu.memory_space<vmem>>, %arg21: memref<2x1x12xf32, #tpu.memory_space<vmem>>) attributes {dimension_semantics = [#tpu.dimension_semantics<parallel>], iteration_bounds = array<i64: 1>, scalar_prefetch = 0 : i64, scratch_operands = 0 : i64, tpu.core_type = #tpu.core_type<tc>, window_params = [{transform_indices = @transform_0, window_bounds = array<i64: 2, 16, 10>}, {transform_indices = @transform_1, window_bounds = array<i64: 2, 16, 1>}, {transform_indices = @transform_2, window_bounds = array<i64: 2, 12, 3>}, {pipeline_mode = #tpu.pipeline_mode<synchronous>, transform_indices = @transform_3, window_bounds = array<i64: 10, 32>}, {pipeline_mode = #tpu.pipeline_mode<synchronous>, transform_indices = @transform_4, window_bounds = array<i64: 1, 32>}, {pipeline_mode = #tpu.pipeline_mode<synchronous>, transform_indices = @transform_5, window_bounds = array<i64: 1, 32>}, {pipeline_mode = #tpu.pipeline_mode<synchronous>, transform_indices = @transform_6, window_bounds = array<i64: 1, 32>}, {pipeline_mode = #tpu.pipeline_mode<synchronous>, transform_indices = @transform_7, window_bounds = array<i64: 1, 32>}, {pipeline_mode = #tpu.pipeline_mode<synchronous>, transform_indices = @transform_8, window_bounds = array<i64: 4, 32, 32>}, {pipeline_mode = #tpu.pipeline_mode<synchronous>, transform_indices = @transform_9, window_bounds = array<i64: 4, 1, 32>}, {pipeline_mode = #tpu.pipeline_mode<synchronous>, transform_indices = @transform_10, window_bounds = array<i64: 32, 128>}, {pipeline_mode = #tpu.pipeline_mode<synchronous>, transform_indices = @transform_11, window_bounds = array<i64: 1, 128>}, {pipeline_mode = #tpu.pipeline_mode<synchronous>, transform_indices = @transform_12, window_bounds = array<i64: 128, 1>}, {pipeline_mode = #tpu.pipeline_mode<synchronous>, transform_indices = @transform_13, window_bounds = array<i64: 1, 1>}, {pipeline_mode = #tpu.pipeline_mode<synchronous>, transform_indices = @transform_14, window_bounds = array<i64: 16, 8>}, {pipeline_mode = #tpu.pipeline_mode<synchronous>, transform_indices = @transform_15, window_bounds = array<i64: 1, 8>}, {pipeline_mode = #tpu.pipeline_mode<synchronous>, transform_indices = @transform_16, window_bounds = array<i64: 3, 8>}, {pipeline_mode = #tpu.pipeline_mode<synchronous>, transform_indices = @transform_17, window_bounds = array<i64: 1, 8>}, {pipeline_mode = #tpu.pipeline_mode<synchronous>, transform_indices = @transform_18, window_bounds = array<i64: 8, 8>}, {pipeline_mode = #tpu.pipeline_mode<synchronous>, transform_indices = @transform_19, window_bounds = array<i64: 1, 8>}, {transform_indices = @transform_20, window_bounds = array<i64: 2, 1, 12>}]} {
    %c0 = arith.constant 0 : index
    %c0_0 = arith.constant 0 : index
    %c0_1 = arith.constant 0 : index
    %0 = vector.load %arg1[%c0, %c0_0, %c0_1] : memref<2x16x10xf32, #tpu.memory_space<vmem>>, vector<2x16x10xf32>
    %1 = vector.shape_cast %0 : vector<2x16x10xf32> to vector<32x10xf32>
    %c0_2 = arith.constant 0 : index
    %c0_3 = arith.constant 0 : index
    %c0_4 = arith.constant 0 : index
    %2 = vector.load %arg2[%c0_2, %c0_3, %c0_4] : memref<2x16x1xf32, #tpu.memory_space<vmem>>, vector<2x16x1xf32>
    %3 = vector.shape_cast %2 : vector<2x16x1xf32> to vector<32x1xf32>
    %c0_5 = arith.constant 0 : index
    %c0_6 = arith.constant 0 : index
    %4 = vector.load %arg4[%c0_5, %c0_6] : memref<10x32xf32, #tpu.memory_space<vmem>>, vector<10x32xf32>
    %cst = arith.constant dense<0.000000e+00> : vector<32x32xf32>
    %5 = tpu.matmul %1, %4, %cst {dimension_numbers = #tpu.dot_dimension_numbers<[1], [0], [0], [1], [0, 0, 1, 1], [], []>} : vector<32x10xf32>, vector<10x32xf32>, vector<32x32xf32> -> vector<32x32xf32>
    %c0_7 = arith.constant 0 : index
    %c0_8 = arith.constant 0 : index
    %6 = vector.load %arg5[%c0_7, %c0_8] : memref<1x32xf32, #tpu.memory_space<vmem>>, vector<1x32xf32>
    %7 = vector.broadcast %3 : vector<32x1xf32> to vector<32x32xf32>
    %8 = vector.broadcast %6 : vector<1x32xf32> to vector<32x32xf32>
    %9 = arith.mulf %7, %8 : vector<32x32xf32>
    %10 = arith.addf %5, %9 : vector<32x32xf32>
    %c0_9 = arith.constant 0 : index
    %c0_10 = arith.constant 0 : index
    %11 = vector.load %arg6[%c0_9, %c0_10] : memref<1x32xf32, #tpu.memory_space<vmem>>, vector<1x32xf32>
    %12 = vector.broadcast %11 : vector<1x32xf32> to vector<32x32xf32>
    %13 = arith.addf %10, %12 : vector<32x32xf32>
    %cst_11 = arith.constant dense<0.000000e+00> : vector<32xf32>
    %14 = vector.multi_reduction <add>, %13, %cst_11 [1] : vector<32x32xf32> to vector<32xf32>
    %15 = vector.shape_cast %14 : vector<32xf32> to vector<32x1xf32>
    %cst_12 = arith.constant 3.200000e+01 : f32
    %16 = vector.broadcast %cst_12 : f32 to vector<32x1xf32>
    %17 = arith.divf %15, %16 : vector<32x1xf32>
    %18 = vector.broadcast %17 : vector<32x1xf32> to vector<32x32xf32>
    %19 = arith.subf %13, %18 : vector<32x32xf32>
    %20 = vector.broadcast %17 : vector<32x1xf32> to vector<32x32xf32>
    %21 = arith.subf %13, %20 : vector<32x32xf32>
    %22 = arith.mulf %19, %21 : vector<32x32xf32>
    %cst_13 = arith.constant dense<0.000000e+00> : vector<32xf32>
    %23 = vector.multi_reduction <add>, %22, %cst_13 [1] : vector<32x32xf32> to vector<32xf32>
    %24 = vector.shape_cast %23 : vector<32xf32> to vector<32x1xf32>
    %cst_14 = arith.constant 3.200000e+01 : f32
    %25 = vector.broadcast %cst_14 : f32 to vector<32x1xf32>
    %26 = arith.divf %24, %25 : vector<32x1xf32>
    %27 = vector.broadcast %17 : vector<32x1xf32> to vector<32x32xf32>
    %28 = arith.subf %13, %27 : vector<32x32xf32>
    %cst_15 = arith.constant 9.99999974E-6 : f32
    %29 = vector.broadcast %cst_15 : f32 to vector<32x1xf32>
    %30 = arith.addf %26, %29 : vector<32x1xf32>
    %31 = math.rsqrt %30 : vector<32x1xf32>
    %32 = vector.broadcast %31 : vector<32x1xf32> to vector<32x32xf32>
    %33 = arith.mulf %28, %32 : vector<32x32xf32>
    %c0_16 = arith.constant 0 : index
    %c0_17 = arith.constant 0 : index
    %34 = vector.load %arg7[%c0_16, %c0_17] : memref<1x32xf32, #tpu.memory_space<vmem>>, vector<1x32xf32>
    %35 = vector.broadcast %34 : vector<1x32xf32> to vector<32x32xf32>
    %36 = arith.mulf %33, %35 : vector<32x32xf32>
    %c0_18 = arith.constant 0 : index
    %c0_19 = arith.constant 0 : index
    %37 = vector.load %arg8[%c0_18, %c0_19] : memref<1x32xf32, #tpu.memory_space<vmem>>, vector<1x32xf32>
    %38 = vector.broadcast %37 : vector<1x32xf32> to vector<32x32xf32>
    %39 = arith.addf %36, %38 : vector<32x32xf32>
    %cst_20 = arith.constant 5.000000e-01 : f32
    %40 = vector.broadcast %cst_20 : f32 to vector<32x32xf32>
    %41 = arith.mulf %40, %39 : vector<32x32xf32>
    %cst_21 = arith.constant 4.471500e-02 : f32
    %42 = vector.broadcast %cst_21 : f32 to vector<32x32xf32>
    %43 = arith.mulf %42, %39 : vector<32x32xf32>
    %44 = arith.mulf %43, %39 : vector<32x32xf32>
    %45 = arith.mulf %44, %39 : vector<32x32xf32>
    %46 = arith.addf %39, %45 : vector<32x32xf32>
    %cst_22 = arith.constant 0.797884583 : f32
    %47 = vector.broadcast %cst_22 : f32 to vector<32x32xf32>
    %48 = arith.mulf %47, %46 : vector<32x32xf32>
    %49 = math.tanh %48 : vector<32x32xf32>
    %cst_23 = arith.constant 1.000000e+00 : f32
    %50 = vector.broadcast %cst_23 : f32 to vector<32x32xf32>
    %51 = arith.addf %50, %49 : vector<32x32xf32>
    %52 = arith.mulf %41, %51 : vector<32x32xf32>
    %c0_24 = arith.constant 0 : index
    %c0_25 = arith.constant 0 : index
    %c0_26 = arith.constant 0 : index
    %53 = vector.load %arg9[%c0_24, %c0_25, %c0_26] : memref<4x32x32xf32, #tpu.memory_space<vmem>>, vector<1x32x32xf32>
    %54 = vector.shape_cast %53 : vector<1x32x32xf32> to vector<32x32xf32>
    %cst_27 = arith.constant dense<0.000000e+00> : vector<32x32xf32>
    %55 = tpu.matmul %52, %54, %cst_27 {dimension_numbers = #tpu.dot_dimension_numbers<[1], [0], [0], [1], [0, 0, 1, 1], [], []>} : vector<32x32xf32>, vector<32x32xf32>, vector<32x32xf32> -> vector<32x32xf32>
    %c0_28 = arith.constant 0 : index
    %c0_29 = arith.constant 0 : index
    %c0_30 = arith.constant 0 : index
    %56 = vector.load %arg10[%c0_28, %c0_29, %c0_30] : memref<4x1x32xf32, #tpu.memory_space<vmem>>, vector<1x1x32xf32>
    %57 = vector.shape_cast %56 : vector<1x1x32xf32> to vector<1x32xf32>
    %58 = vector.broadcast %57 : vector<1x32xf32> to vector<32x32xf32>
    %59 = arith.addf %55, %58 : vector<32x32xf32>
    %cst_31 = arith.constant 0.000000e+00 : f32
    %60 = vector.broadcast %cst_31 : f32 to vector<32x32xf32>
    %61 = arith.maximumf %59, %60 : vector<32x32xf32>
    %c1 = arith.constant 1 : index
    %c0_32 = arith.constant 0 : index
    %c0_33 = arith.constant 0 : index
    %62 = vector.load %arg9[%c1, %c0_32, %c0_33] : memref<4x32x32xf32, #tpu.memory_space<vmem>>, vector<1x32x32xf32>
    %63 = vector.shape_cast %62 : vector<1x32x32xf32> to vector<32x32xf32>
    %cst_34 = arith.constant dense<0.000000e+00> : vector<32x32xf32>
    %64 = tpu.matmul %61, %63, %cst_34 {dimension_numbers = #tpu.dot_dimension_numbers<[1], [0], [0], [1], [0, 0, 1, 1], [], []>} : vector<32x32xf32>, vector<32x32xf32>, vector<32x32xf32> -> vector<32x32xf32>
    %c1_35 = arith.constant 1 : index
    %c0_36 = arith.constant 0 : index
    %c0_37 = arith.constant 0 : index
    %65 = vector.load %arg10[%c1_35, %c0_36, %c0_37] : memref<4x1x32xf32, #tpu.memory_space<vmem>>, vector<1x1x32xf32>
    %66 = vector.shape_cast %65 : vector<1x1x32xf32> to vector<1x32xf32>
    %67 = vector.broadcast %66 : vector<1x32xf32> to vector<32x32xf32>
    %68 = arith.addf %64, %67 : vector<32x32xf32>
    %cst_38 = arith.constant 0.000000e+00 : f32
    %69 = vector.broadcast %cst_38 : f32 to vector<32x32xf32>
    %70 = arith.maximumf %68, %69 : vector<32x32xf32>
    %c2 = arith.constant 2 : index
    %c0_39 = arith.constant 0 : index
    %c0_40 = arith.constant 0 : index
    %71 = vector.load %arg9[%c2, %c0_39, %c0_40] : memref<4x32x32xf32, #tpu.memory_space<vmem>>, vector<1x32x32xf32>
    %72 = vector.shape_cast %71 : vector<1x32x32xf32> to vector<32x32xf32>
    %cst_41 = arith.constant dense<0.000000e+00> : vector<32x32xf32>
    %73 = tpu.matmul %70, %72, %cst_41 {dimension_numbers = #tpu.dot_dimension_numbers<[1], [0], [0], [1], [0, 0, 1, 1], [], []>} : vector<32x32xf32>, vector<32x32xf32>, vector<32x32xf32> -> vector<32x32xf32>
    %c2_42 = arith.constant 2 : index
    %c0_43 = arith.constant 0 : index
    %c0_44 = arith.constant 0 : index
    %74 = vector.load %arg10[%c2_42, %c0_43, %c0_44] : memref<4x1x32xf32, #tpu.memory_space<vmem>>, vector<1x1x32xf32>
    %75 = vector.shape_cast %74 : vector<1x1x32xf32> to vector<1x32xf32>
    %76 = vector.broadcast %75 : vector<1x32xf32> to vector<32x32xf32>
    %77 = arith.addf %73, %76 : vector<32x32xf32>
    %cst_45 = arith.constant 0.000000e+00 : f32
    %78 = vector.broadcast %cst_45 : f32 to vector<32x32xf32>
    %79 = arith.maximumf %77, %78 : vector<32x32xf32>
    %c3 = arith.constant 3 : index
    %c0_46 = arith.constant 0 : index
    %c0_47 = arith.constant 0 : index
    %80 = vector.load %arg9[%c3, %c0_46, %c0_47] : memref<4x32x32xf32, #tpu.memory_space<vmem>>, vector<1x32x32xf32>
    %81 = vector.shape_cast %80 : vector<1x32x32xf32> to vector<32x32xf32>
    %cst_48 = arith.constant dense<0.000000e+00> : vector<32x32xf32>
    %82 = tpu.matmul %79, %81, %cst_48 {dimension_numbers = #tpu.dot_dimension_numbers<[1], [0], [0], [1], [0, 0, 1, 1], [], []>} : vector<32x32xf32>, vector<32x32xf32>, vector<32x32xf32> -> vector<32x32xf32>
    %c3_49 = arith.constant 3 : index
    %c0_50 = arith.constant 0 : index
    %c0_51 = arith.constant 0 : index
    %83 = vector.load %arg10[%c3_49, %c0_50, %c0_51] : memref<4x1x32xf32, #tpu.memory_space<vmem>>, vector<1x1x32xf32>
    %84 = vector.shape_cast %83 : vector<1x1x32xf32> to vector<1x32xf32>
    %85 = vector.broadcast %84 : vector<1x32xf32> to vector<32x32xf32>
    %86 = arith.addf %82, %85 : vector<32x32xf32>
    %cst_52 = arith.constant 0.000000e+00 : f32
    %87 = vector.broadcast %cst_52 : f32 to vector<32x32xf32>
    %88 = arith.maximumf %86, %87 : vector<32x32xf32>
    %c0_53 = arith.constant 0 : index
    %c0_54 = arith.constant 0 : index
    %89 = vector.load %arg11[%c0_53, %c0_54] : memref<32x128xf32, #tpu.memory_space<vmem>>, vector<32x128xf32>
    %cst_55 = arith.constant dense<0.000000e+00> : vector<32x128xf32>
    %90 = tpu.matmul %88, %89, %cst_55 {dimension_numbers = #tpu.dot_dimension_numbers<[1], [0], [0], [1], [0, 0, 1, 1], [], []>} : vector<32x32xf32>, vector<32x128xf32>, vector<32x128xf32> -> vector<32x128xf32>
    %c0_56 = arith.constant 0 : index
    %c0_57 = arith.constant 0 : index
    %91 = vector.load %arg12[%c0_56, %c0_57] : memref<1x128xf32, #tpu.memory_space<vmem>>, vector<1x128xf32>
    %92 = vector.broadcast %91 : vector<1x128xf32> to vector<32x128xf32>
    %93 = arith.addf %90, %92 : vector<32x128xf32>
    %cst_58 = arith.constant 5.000000e-01 : f32
    %94 = vector.broadcast %cst_58 : f32 to vector<32x128xf32>
    %95 = arith.mulf %94, %93 : vector<32x128xf32>
    %cst_59 = arith.constant 4.471500e-02 : f32
    %96 = vector.broadcast %cst_59 : f32 to vector<32x128xf32>
    %97 = arith.mulf %96, %93 : vector<32x128xf32>
    %98 = arith.mulf %97, %93 : vector<32x128xf32>
    %99 = arith.mulf %98, %93 : vector<32x128xf32>
    %100 = arith.addf %93, %99 : vector<32x128xf32>
    %cst_60 = arith.constant 0.797884583 : f32
    %101 = vector.broadcast %cst_60 : f32 to vector<32x128xf32>
    %102 = arith.mulf %101, %100 : vector<32x128xf32>
    %103 = math.tanh %102 : vector<32x128xf32>
    %cst_61 = arith.constant 1.000000e+00 : f32
    %104 = vector.broadcast %cst_61 : f32 to vector<32x128xf32>
    %105 = arith.addf %104, %103 : vector<32x128xf32>
    %106 = arith.mulf %95, %105 : vector<32x128xf32>
    %c0_62 = arith.constant 0 : index
    %c0_63 = arith.constant 0 : index
    %107 = vector.load %arg13[%c0_62, %c0_63] : memref<128x1xf32, #tpu.memory_space<vmem>>, vector<128x1xf32>
    %cst_64 = arith.constant dense<0.000000e+00> : vector<32x1xf32>
    %108 = tpu.matmul %106, %107, %cst_64 {dimension_numbers = #tpu.dot_dimension_numbers<[1], [0], [0], [1], [0, 0, 1, 1], [], []>} : vector<32x128xf32>, vector<128x1xf32>, vector<32x1xf32> -> vector<32x1xf32>
    %c0_65 = arith.constant 0 : index
    %c0_66 = arith.constant 0 : index
    %109 = vector.load %arg14[%c0_65, %c0_66] : memref<1x1xf32, #tpu.memory_space<vmem>>, vector<1x1xf32>
    %110 = vector.broadcast %109 : vector<1x1xf32> to vector<32x1xf32>
    %111 = arith.addf %108, %110 : vector<32x1xf32>
    %cst_67 = arith.constant 5.000000e-01 : f32
    %112 = vector.broadcast %cst_67 : f32 to vector<32x1xf32>
    %113 = arith.mulf %112, %111 : vector<32x1xf32>
    %cst_68 = arith.constant 4.471500e-02 : f32
    %114 = vector.broadcast %cst_68 : f32 to vector<32x1xf32>
    %115 = arith.mulf %114, %111 : vector<32x1xf32>
    %116 = arith.mulf %115, %111 : vector<32x1xf32>
    %117 = arith.mulf %116, %111 : vector<32x1xf32>
    %118 = arith.addf %111, %117 : vector<32x1xf32>
    %cst_69 = arith.constant 0.797884583 : f32
    %119 = vector.broadcast %cst_69 : f32 to vector<32x1xf32>
    %120 = arith.mulf %119, %118 : vector<32x1xf32>
    %121 = math.tanh %120 : vector<32x1xf32>
    %cst_70 = arith.constant 1.000000e+00 : f32
    %122 = vector.broadcast %cst_70 : f32 to vector<32x1xf32>
    %123 = arith.addf %122, %121 : vector<32x1xf32>
    %124 = arith.mulf %113, %123 : vector<32x1xf32>
    %c0_71 = arith.constant 0 : index
    %c0_72 = arith.constant 0 : index
    %c0_73 = arith.constant 0 : index
    %125 = vector.load %arg3[%c0_71, %c0_72, %c0_73] : memref<2x12x3xf32, #tpu.memory_space<vmem>>, vector<2x12x3xf32>
    %126 = vector.shape_cast %125 : vector<2x12x3xf32> to vector<24x3xf32>
    %c0_74 = arith.constant 0 : index
    %c0_75 = arith.constant 0 : index
    %127 = vector.load %arg17[%c0_74, %c0_75] : memref<3x8xf32, #tpu.memory_space<vmem>>, vector<3x8xf32>
    %cst_76 = arith.constant dense<0.000000e+00> : vector<24x8xf32>
    %128 = tpu.matmul %126, %127, %cst_76 {dimension_numbers = #tpu.dot_dimension_numbers<[1], [0], [0], [1], [0, 0, 1, 1], [], []>} : vector<24x3xf32>, vector<3x8xf32>, vector<24x8xf32> -> vector<24x8xf32>
    %c0_77 = arith.constant 0 : index
    %c0_78 = arith.constant 0 : index
    %129 = vector.load %arg18[%c0_77, %c0_78] : memref<1x8xf32, #tpu.memory_space<vmem>>, vector<1x8xf32>
    %130 = vector.broadcast %129 : vector<1x8xf32> to vector<24x8xf32>
    %131 = arith.addf %128, %130 : vector<24x8xf32>
    %cst_79 = arith.constant 5.000000e-01 : f32
    %132 = vector.broadcast %cst_79 : f32 to vector<24x8xf32>
    %133 = arith.mulf %132, %131 : vector<24x8xf32>
    %cst_80 = arith.constant 4.471500e-02 : f32
    %134 = vector.broadcast %cst_80 : f32 to vector<24x8xf32>
    %135 = arith.mulf %134, %131 : vector<24x8xf32>
    %136 = arith.mulf %135, %131 : vector<24x8xf32>
    %137 = arith.mulf %136, %131 : vector<24x8xf32>
    %138 = arith.addf %131, %137 : vector<24x8xf32>
    %cst_81 = arith.constant 0.797884583 : f32
    %139 = vector.broadcast %cst_81 : f32 to vector<24x8xf32>
    %140 = arith.mulf %139, %138 : vector<24x8xf32>
    %141 = math.tanh %140 : vector<24x8xf32>
    %cst_82 = arith.constant 1.000000e+00 : f32
    %142 = vector.broadcast %cst_82 : f32 to vector<24x8xf32>
    %143 = arith.addf %142, %141 : vector<24x8xf32>
    %144 = arith.mulf %133, %143 : vector<24x8xf32>
    %c0_83 = arith.constant 0 : index
    %c0_84 = arith.constant 0 : index
    %145 = vector.load %arg19[%c0_83, %c0_84] : memref<8x8xf32, #tpu.memory_space<vmem>>, vector<8x8xf32>
    %cst_85 = arith.constant dense<0.000000e+00> : vector<24x8xf32>
    %146 = tpu.matmul %144, %145, %cst_85 {dimension_numbers = #tpu.dot_dimension_numbers<[1], [0], [0], [1], [0, 0, 1, 1], [], []>} : vector<24x8xf32>, vector<8x8xf32>, vector<24x8xf32> -> vector<24x8xf32>
    %c0_86 = arith.constant 0 : index
    %c0_87 = arith.constant 0 : index
    %147 = vector.load %arg20[%c0_86, %c0_87] : memref<1x8xf32, #tpu.memory_space<vmem>>, vector<1x8xf32>
    %148 = vector.broadcast %147 : vector<1x8xf32> to vector<24x8xf32>
    %149 = arith.addf %146, %148 : vector<24x8xf32>
    %cst_88 = arith.constant 5.000000e-01 : f32
    %150 = vector.broadcast %cst_88 : f32 to vector<24x8xf32>
    %151 = arith.mulf %150, %149 : vector<24x8xf32>
    %cst_89 = arith.constant 4.471500e-02 : f32
    %152 = vector.broadcast %cst_89 : f32 to vector<24x8xf32>
    %153 = arith.mulf %152, %149 : vector<24x8xf32>
    %154 = arith.mulf %153, %149 : vector<24x8xf32>
    %155 = arith.mulf %154, %149 : vector<24x8xf32>
    %156 = arith.addf %149, %155 : vector<24x8xf32>
    %cst_90 = arith.constant 0.797884583 : f32
    %157 = vector.broadcast %cst_90 : f32 to vector<24x8xf32>
    %158 = arith.mulf %157, %156 : vector<24x8xf32>
    %159 = math.tanh %158 : vector<24x8xf32>
    %cst_91 = arith.constant 1.000000e+00 : f32
    %160 = vector.broadcast %cst_91 : f32 to vector<24x8xf32>
    %161 = arith.addf %160, %159 : vector<24x8xf32>
    %162 = arith.mulf %151, %161 : vector<24x8xf32>
    %163 = vector.extract_strided_slice %124 {offsets = [0, 0], sizes = [16, 1], strides = [1, 1]} : vector<32x1xf32> to vector<16x1xf32>
    %c0_92 = arith.constant 0 : index
    %c0_93 = arith.constant 0 : index
    %164 = vector.load %arg15[%c0_92, %c0_93] : memref<16x8xf32, #tpu.memory_space<vmem>>, vector<16x8xf32>
    %cst_94 = arith.constant dense<0.000000e+00> : vector<1x8xf32>
    %165 = tpu.matmul %163, %164, %cst_94 {dimension_numbers = #tpu.dot_dimension_numbers<[0], [0], [1], [1], [0, 1, 1, 1], [], []>} : vector<16x1xf32>, vector<16x8xf32>, vector<1x8xf32> -> vector<1x8xf32>
    %c0_95 = arith.constant 0 : index
    %c0_96 = arith.constant 0 : index
    %166 = vector.load %arg16[%c0_95, %c0_96] : memref<1x8xf32, #tpu.memory_space<vmem>>, vector<1x8xf32>
    %167 = arith.addf %165, %166 : vector<1x8xf32>
    %cst_97 = arith.constant 5.000000e-01 : f32
    %168 = vector.broadcast %cst_97 : f32 to vector<1x8xf32>
    %169 = arith.mulf %168, %167 : vector<1x8xf32>
    %cst_98 = arith.constant 4.471500e-02 : f32
    %170 = vector.broadcast %cst_98 : f32 to vector<1x8xf32>
    %171 = arith.mulf %170, %167 : vector<1x8xf32>
    %172 = arith.mulf %171, %167 : vector<1x8xf32>
    %173 = arith.mulf %172, %167 : vector<1x8xf32>
    %174 = arith.addf %167, %173 : vector<1x8xf32>
    %cst_99 = arith.constant 0.797884583 : f32
    %175 = vector.broadcast %cst_99 : f32 to vector<1x8xf32>
    %176 = arith.mulf %175, %174 : vector<1x8xf32>
    %177 = math.tanh %176 : vector<1x8xf32>
    %cst_100 = arith.constant 1.000000e+00 : f32
    %178 = vector.broadcast %cst_100 : f32 to vector<1x8xf32>
    %179 = arith.addf %178, %177 : vector<1x8xf32>
    %180 = arith.mulf %169, %179 : vector<1x8xf32>
    %181 = vector.extract_strided_slice %162 {offsets = [0, 0], sizes = [12, 8], strides = [1, 1]} : vector<24x8xf32> to vector<12x8xf32>
    %cst_101 = arith.constant dense<0.000000e+00> : vector<1x12xf32>
    %182 = tpu.matmul %180, %181, %cst_101 {dimension_numbers = #tpu.dot_dimension_numbers<[1], [1], [0], [0], [0, 0, 1, 0], [], []>} : vector<1x8xf32>, vector<12x8xf32>, vector<1x12xf32> -> vector<1x12xf32>
    %c0_102 = arith.constant 0 : index
    %c0_103 = arith.constant 0 : index
    %c0_104 = arith.constant 0 : index
    %183 = vector.load %arg21[%c0_102, %c0_103, %c0_104] : memref<2x1x12xf32, #tpu.memory_space<vmem>>, vector<1x1x12xf32>
    %184 = vector.shape_cast %183 : vector<1x1x12xf32> to vector<1x12xf32>
    %185 = vector.shape_cast %182 : vector<1x12xf32> to vector<1x1x12xf32>
    tpu.vector_store %arg21[%c0_102, %c0_103, %c0_104], %185 {strides = array<i32>} : memref<2x1x12xf32, #tpu.memory_space<vmem>>, vector<1x1x12xf32>,
    %186 = vector.extract_strided_slice %124 {offsets = [16, 0], sizes = [16, 1], strides = [1, 1]} : vector<32x1xf32> to vector<16x1xf32>
    %c0_105 = arith.constant 0 : index
    %c0_106 = arith.constant 0 : index
    %187 = vector.load %arg15[%c0_105, %c0_106] : memref<16x8xf32, #tpu.memory_space<vmem>>, vector<16x8xf32>
    %cst_107 = arith.constant dense<0.000000e+00> : vector<1x8xf32>
    %188 = tpu.matmul %186, %187, %cst_107 {dimension_numbers = #tpu.dot_dimension_numbers<[0], [0], [1], [1], [0, 1, 1, 1], [], []>} : vector<16x1xf32>, vector<16x8xf32>, vector<1x8xf32> -> vector<1x8xf32>
    %c0_108 = arith.constant 0 : index
    %c0_109 = arith.constant 0 : index
    %189 = vector.load %arg16[%c0_108, %c0_109] : memref<1x8xf32, #tpu.memory_space<vmem>>, vector<1x8xf32>
    %190 = arith.addf %188, %189 : vector<1x8xf32>
    %cst_110 = arith.constant 5.000000e-01 : f32
    %191 = vector.broadcast %cst_110 : f32 to vector<1x8xf32>
    %192 = arith.mulf %191, %190 : vector<1x8xf32>
    %cst_111 = arith.constant 4.471500e-02 : f32
    %193 = vector.broadcast %cst_111 : f32 to vector<1x8xf32>
    %194 = arith.mulf %193, %190 : vector<1x8xf32>
    %195 = arith.mulf %194, %190 : vector<1x8xf32>
    %196 = arith.mulf %195, %190 : vector<1x8xf32>
    %197 = arith.addf %190, %196 : vector<1x8xf32>
    %cst_112 = arith.constant 0.797884583 : f32
    %198 = vector.broadcast %cst_112 : f32 to vector<1x8xf32>
    %199 = arith.mulf %198, %197 : vector<1x8xf32>
    %200 = math.tanh %199 : vector<1x8xf32>
    %cst_113 = arith.constant 1.000000e+00 : f32
    %201 = vector.broadcast %cst_113 : f32 to vector<1x8xf32>
    %202 = arith.addf %201, %200 : vector<1x8xf32>
    %203 = arith.mulf %192, %202 : vector<1x8xf32>
    %204 = vector.extract_strided_slice %162 {offsets = [12, 0], sizes = [12, 8], strides = [1, 1]} : vector<24x8xf32> to vector<12x8xf32>
    %cst_114 = arith.constant dense<0.000000e+00> : vector<1x12xf32>
    %205 = tpu.matmul %203, %204, %cst_114 {dimension_numbers = #tpu.dot_dimension_numbers<[1], [1], [0], [0], [0, 0, 1, 0], [], []>} : vector<1x8xf32>, vector<12x8xf32>, vector<1x12xf32> -> vector<1x12xf32>
    %c1_115 = arith.constant 1 : index
    %c0_116 = arith.constant 0 : index
    %c0_117 = arith.constant 0 : index
    %206 = vector.load %arg21[%c1_115, %c0_116, %c0_117] : memref<2x1x12xf32, #tpu.memory_space<vmem>>, vector<1x1x12xf32>
    %207 = vector.shape_cast %206 : vector<1x1x12xf32> to vector<1x12xf32>
    %208 = vector.shape_cast %205 : vector<1x12xf32> to vector<1x1x12xf32>
    tpu.vector_store %arg21[%c1_115, %c0_116, %c0_117], %208 {strides = array<i32>} : memref<2x1x12xf32, #tpu.memory_space<vmem>>, vector<1x1x12xf32>,
    return
  }
  func.func @transform_0(%arg0: i32) -> (i32, i32, i32) {
    %c0_i32 = arith.constant 0 : i32
    %c0_i32_0 = arith.constant 0 : i32
    %c0_i32_1 = arith.constant 0 : i32
    return %arg0, %c0_i32, %c0_i32_0 : i32, i32, i32
  }
  func.func @transform_1(%arg0: i32) -> (i32, i32, i32) {
    %c0_i32 = arith.constant 0 : i32
    %c0_i32_0 = arith.constant 0 : i32
    %c0_i32_1 = arith.constant 0 : i32
    return %arg0, %c0_i32, %c0_i32_0 : i32, i32, i32
  }
  func.func @transform_2(%arg0: i32) -> (i32, i32, i32) {
    %c0_i32 = arith.constant 0 : i32
    %c0_i32_0 = arith.constant 0 : i32
    %c0_i32_1 = arith.constant 0 : i32
    return %arg0, %c0_i32, %c0_i32_0 : i32, i32, i32
  }
  func.func @transform_3(%arg0: i32) -> (i32, i32) {
    %c0_i32 = arith.constant 0 : i32
    %c0_i32_0 = arith.constant 0 : i32
    %c0_i32_1 = arith.constant 0 : i32
    return %c0_i32, %c0_i32_0 : i32, i32
  }
  func.func @transform_4(%arg0: i32) -> (i32, i32) {
    %c0_i32 = arith.constant 0 : i32
    %c0_i32_0 = arith.constant 0 : i32
    %c0_i32_1 = arith.constant 0 : i32
    return %c0_i32, %c0_i32_0 : i32, i32
  }
  func.func @transform_5(%arg0: i32) -> (i32, i32) {
    %c0_i32 = arith.constant 0 : i32
    %c0_i32_0 = arith.constant 0 : i32
    %c0_i32_1 = arith.constant 0 : i32
    return %c0_i32, %c0_i32_0 : i32, i32
  }
  func.func @transform_6(%arg0: i32) -> (i32, i32) {
    %c0_i32 = arith.constant 0 : i32
    %c0_i32_0 = arith.constant 0 : i32
    %c0_i32_1 = arith.constant 0 : i32
    return %c0_i32, %c0_i32_0 : i32, i32
  }
  func.func @transform_7(%arg0: i32) -> (i32, i32) {
    %c0_i32 = arith.constant 0 : i32
    %c0_i32_0 = arith.constant 0 : i32
    %c0_i32_1 = arith.constant 0 : i32
    return %c0_i32, %c0_i32_0 : i32, i32
  }
  func.func @transform_8(%arg0: i32) -> (i32, i32, i32) {
    %c0_i32 = arith.constant 0 : i32
    %c0_i32_0 = arith.constant 0 : i32
    %c0_i32_1 = arith.constant 0 : i32
    %c0_i32_2 = arith.constant 0 : i32
    return %c0_i32, %c0_i32_0, %c0_i32_1 : i32, i32, i32
  }
  func.func @transform_9(%arg0: i32) -> (i32, i32, i32) {
    %c0_i32 = arith.constant 0 : i32
    %c0_i32_0 = arith.constant 0 : i32
    %c0_i32_1 = arith.constant 0 : i32
    %c0_i32_2 = arith.constant 0 : i32
    return %c0_i32, %c0_i32_0, %c0_i32_1 : i32, i32, i32
  }
  func.func @transform_10(%arg0: i32) -> (i32, i32) {
    %c0_i32 = arith.constant 0 : i32
    %c0_i32_0 = arith.constant 0 : i32
    %c0_i32_1 = arith.constant 0 : i32
    return %c0_i32, %c0_i32_0 : i32, i32
  }
  func.func @transform_11(%arg0: i32) -> (i32, i32) {
    %c0_i32 = arith.constant 0 : i32
    %c0_i32_0 = arith.constant 0 : i32
    %c0_i32_1 = arith.constant 0 : i32
    return %c0_i32, %c0_i32_0 : i32, i32
  }
  func.func @transform_12(%arg0: i32) -> (i32, i32) {
    %c0_i32 = arith.constant 0 : i32
    %c0_i32_0 = arith.constant 0 : i32
    %c0_i32_1 = arith.constant 0 : i32
    return %c0_i32, %c0_i32_0 : i32, i32
  }
  func.func @transform_13(%arg0: i32) -> (i32, i32) {
    %c0_i32 = arith.constant 0 : i32
    %c0_i32_0 = arith.constant 0 : i32
    %c0_i32_1 = arith.constant 0 : i32
    return %c0_i32, %c0_i32_0 : i32, i32
  }
  func.func @transform_14(%arg0: i32) -> (i32, i32) {
    %c0_i32 = arith.constant 0 : i32
    %c0_i32_0 = arith.constant 0 : i32
    %c0_i32_1 = arith.constant 0 : i32
    return %c0_i32, %c0_i32_0 : i32, i32
  }
  func.func @transform_15(%arg0: i32) -> (i32, i32) {
    %c0_i32 = arith.constant 0 : i32
    %c0_i32_0 = arith.constant 0 : i32
    %c0_i32_1 = arith.constant 0 : i32
    return %c0_i32, %c0_i32_0 : i32, i32
  }
  func.func @transform_16(%arg0: i32) -> (i32, i32) {
    %c0_i32 = arith.constant 0 : i32
    %c0_i32_0 = arith.constant 0 : i32
    %c0_i32_1 = arith.constant 0 : i32
    return %c0_i32, %c0_i32_0 : i32, i32
  }
  func.func @transform_17(%arg0: i32) -> (i32, i32) {
    %c0_i32 = arith.constant 0 : i32
    %c0_i32_0 = arith.constant 0 : i32
    %c0_i32_1 = arith.constant 0 : i32
    return %c0_i32, %c0_i32_0 : i32, i32
  }
  func.func @transform_18(%arg0: i32) -> (i32, i32) {
    %c0_i32 = arith.constant 0 : i32
    %c0_i32_0 = arith.constant 0 : i32
    %c0_i32_1 = arith.constant 0 : i32
    return %c0_i32, %c0_i32_0 : i32, i32
  }
  func.func @transform_19(%arg0: i32) -> (i32, i32) {
    %c0_i32 = arith.constant 0 : i32
    %c0_i32_0 = arith.constant 0 : i32
    %c0_i32_1 = arith.constant 0 : i32
    return %c0_i32, %c0_i32_0 : i32, i32
  }
  func.func @transform_20(%arg0: i32) -> (i32, i32, i32) {
    %c0_i32 = arith.constant 0 : i32
    %c0_i32_0 = arith.constant 0 : i32
    %c0_i32_1 = arith.constant 0 : i32
    return %arg0, %c0_i32, %c0_i32_0 : i32, i32, i32
  }
}

</mosaic_0001>

<bundles_post_ra>
// kernel: tpu_custom_call.1
= control target key start
LH: loop header
LB: loop body
LE: loop exit
PB: predicated region body
PF: predicated region fallthrough
CT: control target
= control target key end

     0   :  { %s2662_s0 = inlined_call_operand.vmem [shape: f32[2,16,10], index: 0, kind: input, shape index: {}]   ;;  %s2663_s1 = inlined_call_operand.vmem [shape: f32[2,16,1], index: 1, kind: input, shape index: {}]   ;;  %s2664_s2 = inlined_call_operand.vmem [shape: f32[2,12,3], index: 2, kind: input, shape index: {}]   ;;  %s2665_s3 = inlined_call_operand.vmem [shape: f32[10,32], index: 3, kind: input, shape index: {}]   ;;  %s2666_s4 = inlined_call_operand.vmem [shape: f32[1,32], index: 4, kind: input, shape index: {}]   ;;  %s2667_s5 = inlined_call_operand.vmem [shape: f32[1,32], index: 5, kind: input, shape index: {}]   ;;  %s2668_s6 = inlined_call_operand.vmem [shape: f32[1,32], index: 6, kind: input, shape index: {}]   ;;  %s2669_s7 = inlined_call_operand.vmem [shape: f32[1,32], index: 7, kind: input, shape index: {}]   ;;  %s2670_s8 = inlined_call_operand.vmem [shape: f32[4,32,32], index: 8, kind: input, shape index: {}]   ;;  %s2671_s9 = inlined_call_operand.vmem [shape: f32[4,1,32], index: 9, kind: input, shape index: {}]   ;;  %s2672_s10 = inlined_call_operand.vmem [shape: f32[32,128], index: 10, kind: input, shape index: {}]   ;;  %s2673_s11 = inlined_call_operand.vmem [shape: f32[1,128], index: 11, kind: input, shape index: {}]   ;;  %s2674_s12 = inlined_call_operand.vmem [shape: f32[128,1], index: 12, kind: input, shape index: {}]   ;;  %s2675_s13 = inlined_call_operand.<no memory space> [shape: f32[1,1], index: 13, kind: input, shape index: {}]   ;;  %s2676_s14 = inlined_call_operand.vmem [shape: f32[16,8], index: 14, kind: input, shape index: {}]   ;;  %s2677_s15 = inlined_call_operand.vmem [shape: f32[1,8], index: 15, kind: input, shape index: {}]   ;;  %s2678_s16 = inlined_call_operand.vmem [shape: f32[3,8], index: 16, kind: input, shape index: {}]   ;;  %s2679_s17 = inlined_call_operand.vmem [shape: f32[1,8], index: 17, kind: input, shape index: {}]   ;;  %s2680_s18 = inlined_call_operand.vmem [shape: f32[8,8], index: 18, kind: input, shape index: {}]   ;;  %s2681_s19 = inlined_call_operand.vmem [shape: f32[1,8], index: 19, kind: input, shape index: {}]   ;;  %s2682_s20 = inlined_call_operand.hbm [shape: f32[2,1,12], index: 20, kind: output, shape index: {}]  }
   0x1   :  { %2687 = sst [smem:[#allocation6_spill]] %s2662_s0  ;;  %v25_v0 = vstv %s2675_s13 }
   0x2   :  { %2688 = sst [smem:[#allocation7_spill]] %s2663_s1  ;;  %26 = vst [vmem:[#allocation2] sm:$0x1] %v25_v0 }
   0x3   :  { %2689 = sst [smem:[#allocation8_spill]] %s2664_s2 }
   0x4   :  { %2690 = sst [smem:[#allocation9_spill]] %s2665_s3 }
   0x5   :  { %2691 = sst [smem:[#allocation10_spill]] %s2666_s4 }
   0x6   :  { %s2692_s2 = sld [smem:[#allocation9_spill]]  ;;  %vm122_vm0 = vcmask 1041408   ;;  %s2693_s28 = sld [smem:[#allocation6_spill]]  ;;  %vm2254_vm1 = vmmov 1   ;;  %vm109_vm3 = vcmask 80896   ;;  %v2255_v5 = vmov 0  }
   0x7   :  { %vm2078_vm2 = vmpackc.low %vm122_vm0, %vm2254_vm1  ;;  %2177 = vset.pattern.permute.xlu0 %v2255_v5  ;;  %s2694_s29 = sld [smem:[#allocation7_spill]]  ;;  %2178 = vset.pattern.permute.xlu1 %v2255_v5 }
   0xc   :  { %v76_v1 = vld [vmem:[%s2692_s2] sm:$0xff]  ;;  %v77_v2 = vld [vmem:[%s2692_s2 + $0x8] sm:$0x3] }
   0xd   :  { %v68_v3 = vld [vmem:[%s2693_s28] sm:$0xff]  ;;  %v2077_v4 = vpack.c.bf16 %v77_v2, %v76_v1  ;;  %v74_v7 = vld [vmem:[%s2694_s29 + $0x10] sm:$0xff]  ;;  %v69_v8 = vld [vmem:[%s2693_s28 + $0x8] sm:$0xff] }
   0xe   :  { %1913 = vmatprep.mubr.msk.f32.mxu1 %vm109_vm3, %v68_v3  ;;  %v72_v6 = vld [vmem:[%s2694_s29] sm:$0xff]  ;;  %v73_v9 = vld [vmem:[%s2694_s29 + $0x8] sm:$0xff] }
   0xf   :  { %2079 = vmatprep.subr.msk.bf16.mxu1 %vm2078_vm2, %v2077_v4  ;;  %81 = vperm.xlu0 %2177, %v72_v6  }
  0x10   :  { %2082 = vmatpush3.bf16.msk.msra.mxu1 %vm2078_vm2, %v2077_v4 }
  0x11   :  { %27 = vsyncpa [#allocation4], 0  ;;  %v70_v10 = vld [vmem:[%s2693_s28 + $0x10] sm:$0xff]  ;;  %91 = vperm.xlu1 %2178, %v74_v7   ;;  %v75_v11 = vld [vmem:[%s2694_s29 + $0x18] sm:$0xff]  ;;  %s2695_s30 = sld [smem:[#allocation10_spill]]  ;;  %vm222_vm4 = vcmask 261120  }
  0x12   :  { %v71_v12 = vld [vmem:[%s2693_s28 + $0x18] sm:$0xff]  ;;  %v1762_v21 = vld [vmem:[%s2667_s5] ss:$0 sm:$0xff]  ;;  %v335_v60 = vld [vmem:[%s2670_s8 + $0x8] sm:$0xff]  ;;  %vm1104_vm5 = vcmask 1042432   ;;  %s2696_s24 = sld [smem:[#allocation8_spill]] }
  0x13   :  { %1914 = vmatmul.mubr.msk.f32.vlgmr.msra.gmra.mrb[0].mxu1 %vm109_vm3, %v69_v8  ;;  %86 = vperm.xlu0 %2177, %v73_v9   ;;  %v334_v59 = vld [vmem:[%s2670_s8] sm:$0xff]  ;;  %v336_v61 = vld [vmem:[%s2670_s8 + $0x10] sm:$0xff]  ;;  %v337_v63 = vld [vmem:[%s2670_s8 + $0x18] sm:$0xff]  ;;  %vm2257_vm6 = vmmov 0   ;;  %vm1097_vm7 = vcmask 23552   ;;  %vm1223_vm8 = vcmask 64512  }
  0x14   :  { %1916 = vmatprep.mubr.msk.f32.mxu1 %vm109_vm3, %v70_v10  ;;  %v2083_v62 = vpack.c.bf16 %v335_v60, %v334_v59  ;;  %v2087_v0 = vpack.c.bf16 %v337_v63, %v336_v61  ;;  %v1770_v1 = vld [vmem:[%s2670_s8 + $0x20] sm:$0xff]  ;;  %v1771_v2 = vld [vmem:[%s2670_s8 + $0x28] sm:$0xff]  ;;  %vm1375_vm9 = vcmask 130048   ;;  %vm2631_vm10 = vmpackc.low %vm1223_vm8, %vm1223_vm8  ;;  %vm1657_vm11 = vcmask 1043456  }
  0x15   :  { %96 = vperm.xlu1 %2178, %v75_v11   ;;  %v2091_v3 = vpack.c.bf16 %v1771_v2, %v1770_v1  ;;  %vm1537_vm12 = vcmask 90112  }
  0x16   :  { %2084 = vmatprep.subr.bf16.mxu1 %v2083_v62 }
  0x17   :  { %1917 = vmatmul.mubr.msk.f32.gmra.mrb[2].mxu1 %vm109_vm3, %v71_v12  ;;  %v1756_v15 = vld [vmem:[%s2695_s30] ss:$0 sm:$0xff]  ;;  %2092 = vmatprep.subr.bf16.mxu0 %v2091_v3 }
  0x18   :  { %2086 = vmatpush3.bf16.msra.mxu1 %v2083_v62  ;;  %2094 = vmatpush3.bf16.msra.mxu0 %v2091_v3 }
  0x19   :  { %2088 = vmatprep.subr.bf16.mxu1 %v2087_v0 }
  0x1c   :  { %2090 = vmatpush3.bf16.msra.mxu1 %v2087_v0 }
  0x8e   :  { %v82_v13 = vpop.permute.xlu0 %81 }
  0x8f   :  { %v105_v19 = vmul.f32 %v1756_v15, %v82_v13 }
  0x90   :  { %v92_v14 = vpop.permute.xlu1 %91 }
  0x91   :  { %v107_v24 = vmul.f32 %v1756_v15, %v92_v14 }
  0x92   :  { %v87_v16 = vpop.permute.xlu0 %86 }
  0x93   :  { %v106_v17 = vmul.f32 %v1756_v15, %v87_v16 }
  0x94   :  { %v97_v18 = vpop.permute.xlu1 %96 }
  0x95   :  { %v108_v26 = vmul.f32 %v1756_v15, %v97_v18 }
  0xe6   :  { %v1915_v20 = vpop.f32.mrb[0].mxu1 }
  0xe7   :  { %v198_v22 = vadd.f32 %v1915_v20, %v106_v17  ;;  %v192_v23 = vpop.f32.mrb[1].mxu1  ;;  %v1763_v17 = vld [vmem:[%s2668_s6] ss:$0 sm:$0xff] }
  0xe8   :  { %v193_v25 = vadd.f32 %v192_v23, %v105_v19  ;;  %v1764_v20 = vld [vmem:[%s2669_s7] ss:$0 sm:$0xff] }
  0xe9   :  { %v219_v27 = vadd.f32 %v1762_v21, %v198_v22 }
  0xea   :  { %v1918_v28 = vpop.f32.mrb[2].mxu1  ;;  %v218_v29 = vadd.f32 %v1762_v21, %v193_v25 }
  0xeb   :  { %v202_v30 = vpop.f32.mrb[3].mxu1  ;;  %v226_v31 = vsel %vm222_vm4, %v219_v27, 0.0  ;;  %v208_v32 = vadd.f32 %v1918_v28, %v108_v26 }
  0xec   :  { %v203_v33 = vadd.f32 %v202_v30, %v107_v24  ;;  %227 = vadd.xlane.f32.xlu1 %v226_v31  ;;  %v223_v34 = vsel %vm222_vm4, %v218_v29, 0.0 }
  0xed   :  { %224 = vadd.xlane.f32.xlu0 %v223_v34  ;;  %v221_v37 = vadd.f32 %v1762_v21, %v208_v32 }
  0xee   :  { %v220_v35 = vadd.f32 %v1762_v21, %v203_v33 }
  0xef   :  { %v232_v38 = vsel %vm222_vm4, %v221_v37, 0.0 }
  0xf0   :  { %v229_v36 = vsel %vm222_vm4, %v220_v35, 0.0 }
  0xf1   :  { %230 = vadd.xlane.f32.xlu0 %v229_v36 }
  0xf5   :  { %233 = vadd.xlane.f32.xlu0 %v232_v38 }
 0x179   :  { %v228_v39 = vpop.xlane.xlu1 %227 }
 0x17a   :  { %v237_v40 = vmul.f32 0.03125, %v228_v39  ;;  %v225_v41 = vpop.xlane.xlu0 %224 }
 0x17b   :  { %v236_v42 = vmul.f32 0.03125, %v225_v41 }
 0x17c   :  { %v241_v43 = vsub.f32 %v219_v27, %v237_v40 }
 0x17d   :  { %v240_v44 = vsub.f32 %v218_v29, %v236_v42 }
 0x17e   :  { %v231_v45 = vpop.xlane.xlu0 %230  ;;  %v245_v46 = vmul.f32 %v241_v43, %v241_v43 }
 0x17f   :  { %v238_v47 = vmul.f32 0.03125, %v231_v45  ;;  %v244_v48 = vmul.f32 %v240_v44, %v240_v44 }
 0x180   :  { %v251_v49 = vsel %vm222_vm4, %v245_v46, 0.0 }
 0x181   :  { %v242_v50 = vsub.f32 %v220_v35, %v238_v47  ;;  %252 = vadd.xlane.f32.xlu0 %v251_v49  ;;  %v248_v51 = vsel %vm222_vm4, %v244_v48, 0.0 }
 0x182   :  { %249 = vadd.xlane.f32.xlu1 %v248_v51  ;;  %v234_v52 = vpop.xlane.xlu0 %233 }
 0x183   :  { %v239_v53 = vmul.f32 0.03125, %v234_v52  ;;  %v246_v54 = vmul.f32 %v242_v50, %v242_v50 }
 0x185   :  { %v243_v55 = vsub.f32 %v221_v37, %v239_v53  ;;  %v254_v56 = vsel %vm222_vm4, %v246_v54, 0.0 }
 0x186   :  { %255 = vadd.xlane.f32.xlu1 %v254_v56 }
 0x187   :  { %v247_v57 = vmul.f32 %v243_v55, %v243_v55 }
 0x189   :  { %v257_v58 = vsel %vm222_vm4, %v247_v57, 0.0 }
 0x18a   :  { %258 = vadd.xlane.f32.xlu0 %v257_v58 }
 0x20e   :  { %v253_v4 = vpop.xlane.xlu0 %252 }
 0x20f   :  { %v261_v5 = vmul.f32 0.03125, %v253_v4  ;;  %v250_v6 = vpop.xlane.xlu1 %249 }
 0x210   :  { %v260_v7 = vmul.f32 0.03125, %v250_v6  ;;  %v1772_v6 = vld [vmem:[%s2670_s8 + $0x30] sm:$0xff] }
 0x211   :  { %v265_v8 = vadd.f32 1e-05, %v261_v5 }
 0x212   :  { %v264_v9 = vadd.f32 1e-05, %v260_v7  ;;  %v1773_v7 = vld [vmem:[%s2670_s8 + $0x38] sm:$0xff] }
 0x213   :  { %2182 = vrsqrt.f32 %v265_v8  ;;  %v256_v10 = vpop.xlane.xlu1 %255  ;;  %v2095_v8 = vpack.c.bf16 %v1773_v7, %v1772_v6 }
 0x214   :  { %2184 = vrsqrt.f32 %v264_v9  ;;  %v262_v11 = vmul.f32 0.03125, %v256_v10  ;;  %v1780_v9 = vld [vmem:[%s2670_s8 + $0x40] sm:$0xff]  ;;  %v1781_v10 = vld [vmem:[%s2670_s8 + $0x48] sm:$0xff] }
 0x215   :  { %2096 = vmatprep.subr.bf16.mxu0 %v2095_v8 }
 0x216   :  { %v266_v12 = vadd.f32 1e-05, %v262_v11  ;;  %2098 = vmatpush3.bf16.msra.mxu0 %v2095_v8  ;;  %v2099_v11 = vpack.c.bf16 %v1781_v10, %v1780_v9 }
 0x217   :  { %v259_v13 = vpop.xlane.xlu0 %258 }
 0x218   :  { %2186 = vrsqrt.f32 %v266_v12  ;;  %v263_v14 = vmul.f32 0.03125, %v259_v13  ;;  %2100 = vmatprep.subr.bf16.mxu1 %v2099_v11  ;;  %v1765_v12 = vld [vmem:[%s2671_s9] ss:$0 sm:$0xff] }
 0x21a   :  { %v267_v15 = vadd.f32 1e-05, %v263_v14 }
 0x21c   :  { %2188 = vrsqrt.f32 %v267_v15 }
 0x21d   :  { %v2183_v16 = vpop.eup %2182 }
 0x21e   :  { %v2185_v18 = vpop.eup %2184  ;;  %v273_v19 = vmul.f32 %v2183_v16, %v241_v43 }
 0x21f   :  { %v272_v21 = vmul.f32 %v2185_v18, %v240_v44 }
 0x220   :  { %v284_v22 = vmul.f32 %v1763_v17, %v273_v19 }
 0x221   :  { %v283_v23 = vmul.f32 %v1763_v17, %v272_v21 }
 0x222   :  { %v2187_v24 = vpop.eup %2186  ;;  %v295_v25 = vadd.f32 %v1764_v20, %v284_v22 }
 0x223   :  { %v294_v26 = vadd.f32 %v1764_v20, %v283_v23  ;;  %v274_v27 = vmul.f32 %v2187_v24, %v242_v50 }
 0x224   :  { %v303_v28 = vmul.f32 0.044715, %v295_v25  ;;  %v299_v59 = vmul.f32 0.5, %v295_v25 }
 0x225   :  { %v285_v29 = vmul.f32 %v1763_v17, %v274_v27  ;;  %v302_v30 = vmul.f32 0.044715, %v294_v26  ;;  %v298_v57 = vmul.f32 0.5, %v294_v26 }
 0x226   :  { %v2189_v31 = vpop.eup %2188  ;;  %v307_v32 = vmul.f32 %v303_v28, %v295_v25  ;;  %v1790_v28 = vld [vmem:[%s2670_s8 + $0x60] sm:$0xff] }
 0x227   :  { %v296_v33 = vadd.f32 %v1764_v20, %v285_v29  ;;  %v275_v34 = vmul.f32 %v2189_v31, %v243_v55  ;;  %v306_v35 = vmul.f32 %v302_v30, %v294_v26  ;;  %v1791_v29 = vld [vmem:[%s2670_s8 + $0x68] sm:$0xff]  ;;  %v1775_v31 = vld [vmem:[%s2671_s9 + $0x1] ss:$0 sm:$0xff] }
 0x228   :  { %v311_v36 = vmul.f32 %v307_v32, %v295_v25  ;;  %v2107_v30 = vpack.c.bf16 %v1791_v29, %v1790_v28  ;;  %v941_v28 = vld [vmem:[%s2674_s12 + $0x48] sm:$0xff] }
 0x229   :  { %v286_v37 = vmul.f32 %v1763_v17, %v275_v34  ;;  %v310_v38 = vmul.f32 %v306_v35, %v294_v26  ;;  %v304_v39 = vmul.f32 0.044715, %v296_v33  ;;  %v300_v63 = vmul.f32 0.5, %v296_v33 }
 0x22a   :  { %v315_v40 = vadd.f32 %v311_v36, %v295_v25  ;;  %v1782_v25 = vld [vmem:[%s2670_s8 + $0x50] sm:$0xff]  ;;  %2108 = vmatprep.subr.bf16.mxu0 %v2107_v30 }
 0x22b   :  { %v297_v41 = vadd.f32 %v1764_v20, %v286_v37  ;;  %v314_v42 = vadd.f32 %v310_v38, %v294_v26  ;;  %v308_v43 = vmul.f32 %v304_v39, %v296_v33  ;;  %v1783_v26 = vld [vmem:[%s2670_s8 + $0x58] sm:$0xff] }
 0x22c   :  { %v319_v44 = vmul.f32 0.7978846, %v315_v40  ;;  %v2103_v27 = vpack.c.bf16 %v1783_v26, %v1782_v25  ;;  %v939_v25 = vld [vmem:[%s2674_s12 + $0x38] sm:$0xff] }
 0x22d   :  { %v318_v45 = vmul.f32 0.7978846, %v314_v42  ;;  %v312_v46 = vmul.f32 %v308_v43, %v296_v33  ;;  %v305_v47 = vmul.f32 0.044715, %v297_v41  ;;  %v301_v3 = vmul.f32 0.5, %v297_v41 }
 0x22e   :  { %2190 = vtanh.f32 %v319_v44  ;;  %v1792_v44 = vld [vmem:[%s2670_s8 + $0x70] sm:$0xff] }
 0x22f   :  { %2192 = vtanh.f32 %v318_v45  ;;  %v316_v48 = vadd.f32 %v312_v46, %v296_v33  ;;  %v309_v49 = vmul.f32 %v305_v47, %v297_v41  ;;  %v1793_v45 = vld [vmem:[%s2670_s8 + $0x78] sm:$0xff]  ;;  %v788_v47 = vld [vmem:[%s2672_s10] sm:$0xff] }
 0x230   :  { %v2111_v46 = vpack.c.bf16 %v1793_v45, %v1792_v44  ;;  %v1078_v44 = vld [vmem:[%s2696_s24 + $0x10] sm:$0xff] }
 0x231   :  { %v320_v50 = vmul.f32 0.7978846, %v316_v48  ;;  %v313_v51 = vmul.f32 %v309_v49, %v297_v41  ;;  %v789_v48 = vld [vmem:[%s2672_s10 + $0x8] sm:$0xff] }
 0x232   :  { %v2115_v49 = vpack.c.bf16 %v789_v48, %v788_v47  ;;  %v1085_v47 = vcombine.high %v1078_v44, %v1078_v44  ;;  %v1079_v48 = vld [vmem:[%s2696_s24 + $0x18] sm:$0xf] }
 0x233   :  { %2194 = vtanh.f32 %v320_v50  ;;  %v317_v52 = vadd.f32 %v313_v51, %v297_v41  ;;  %v1785_v50 = vld [vmem:[%s2671_s9 + $0x2] ss:$0 sm:$0xff] }
 0x235   :  { %v321_v53 = vmul.f32 0.7978846, %v317_v52 }
 0x237   :  { %2196 = vtanh.f32 %v321_v53 }
 0x238   :  { %v2191_v54 = vpop.eup %2190 }
 0x239   :  { %v2193_v55 = vpop.eup %2192  ;;  %v327_v56 = vadd.f32 1.0, %v2191_v54 }
 0x23a   :  { %v326_v58 = vadd.f32 1.0, %v2193_v55 }
 0x23b   :  { %v331_v62 = vmul.f32 %v327_v56, %v299_v59 }
 0x23c   :  { %v330_v60 = vmul.f32 %v326_v58, %v298_v57 }
 0x23d   :  { %v2195_v61 = vpop.eup %2194 }
 0x23e   :  { %1927 = vmatprep.mubr.msk.f32.mxu1 %vm222_vm4, %v330_v60  ;;  %v328_v0 = vadd.f32 1.0, %v2195_v61 }
 0x23f   :  { %1928 = vmatmul.mubr.msk.f32.vlgmr.msra.gmra.mrb[4].mxu1 %vm222_vm4, %v331_v62 }
 0x240   :  { %v332_v1 = vmul.f32 %v328_v0, %v300_v63  ;;  %2102 = vmatpush3.bf16.msra.mxu1 %v2099_v11  ;;  %v790_v63 = vld [vmem:[%s2672_s10 + $0x10] sm:$0xff]  ;;  %v791_v0 = vld [vmem:[%s2672_s10 + $0x18] sm:$0xff] }
 0x241   :  { %v2197_v2 = vpop.eup %2196  ;;  %2104 = vmatprep.subr.bf16.mxu1 %v2103_v27 }
 0x242   :  { %1930 = vmatprep.mubr.msk.f32.mxu1 %vm222_vm4, %v332_v1  ;;  %v329_v4 = vadd.f32 1.0, %v2197_v2  ;;  %v2119_v1 = vpack.c.bf16 %v791_v0, %v790_v63  ;;  %v932_v2 = vld [vmem:[%s2674_s12] sm:$0xff] }
 0x244   :  { %v333_v5 = vmul.f32 %v329_v4, %v301_v3  ;;  %2106 = vmatpush3.bf16.msra.mxu1 %v2103_v27  ;;  %v933_v3 = vld [vmem:[%s2674_s12 + $0x8] sm:$0xff]  ;;  %v940_v27 = vld [vmem:[%s2674_s12 + $0x40] sm:$0xff] }
 0x245   :  { %2116 = vmatprep.subr.bf16.mxu1 %v2115_v49  ;;  %v2123_v4 = vpack.c.bf16 %v933_v3, %v932_v2  ;;  %v2139_v29 = vpack.c.bf16 %v941_v28, %v940_v27 }
 0x246   :  { %1931 = vmatmul.mubr.msk.f32.gmra.mrb[6].mxu1 %vm222_vm4, %v333_v5  ;;  %v1795_v5 = vld [vmem:[%s2671_s9 + $0x3] ss:$0 sm:$0xff] }
 0x312   :  { %v1929_v13 = vpop.f32.mrb[4].mxu1 }
 0x313   :  { %v429_v14 = vadd.f32 %v1929_v13, %v1765_v12  ;;  %v423_v15 = vpop.f32.mrb[5].mxu1 }
 0x314   :  { %v424_v16 = vadd.f32 %v1765_v12, %v423_v15 }
 0x315   :  { %v443_v18 = vmax.f32 %v429_v14, 0.0 }
 0x316   :  { %v442_v17 = vmax.f32 %v424_v16, 0.0 }
 0x318   :  { %1941 = vmatprep.mubr.msk.f32.mxu0 %vm222_vm4, %v442_v17 }
 0x319   :  { %v1932_v19 = vpop.f32.mrb[6].mxu1  ;;  %1942 = vmatmul.mubr.msk.f32.vlgmr.msra.gmra.mrb[0].mxu0 %vm222_vm4, %v443_v18  ;;  %v934_v18 = vld [vmem:[%s2674_s12 + $0x10] sm:$0xff] }
 0x31a   :  { %v439_v20 = vadd.f32 %v1932_v19, %v1765_v12  ;;  %v433_v21 = vpop.f32.mrb[7].mxu1  ;;  %2110 = vmatpush3.bf16.msra.mxu0 %v2107_v30  ;;  %v935_v19 = vld [vmem:[%s2674_s12 + $0x18] sm:$0xff]  ;;  %v942_v30 = vld [vmem:[%s2674_s12 + $0x50] sm:$0xff] }
 0x31b   :  { %v434_v22 = vadd.f32 %v1765_v12, %v433_v21  ;;  %2112 = vmatprep.subr.bf16.mxu0 %v2111_v46  ;;  %v936_v21 = vld [vmem:[%s2674_s12 + $0x20] sm:$0xff] }
 0x31c   :  { %v445_v24 = vmax.f32 %v439_v20, 0.0  ;;  %v2127_v20 = vpack.c.bf16 %v935_v19, %v934_v18 }
 0x31d   :  { %v444_v23 = vmax.f32 %v434_v22, 0.0  ;;  %v937_v22 = vld [vmem:[%s2674_s12 + $0x28] sm:$0xff] }
 0x31e   :  { %2114 = vmatpush3.bf16.msra.mxu0 %v2111_v46 }
 0x31f   :  { %1944 = vmatprep.mubr.msk.f32.mxu0 %vm222_vm4, %v444_v23  ;;  %2124 = vmatprep.subr.bf16.mxu0 %v2123_v4  ;;  %v2131_v23 = vpack.c.bf16 %v937_v22, %v936_v21 }
 0x320   :  { %1945 = vmatmul.mubr.msk.f32.gmra.mrb[2].mxu0 %vm222_vm4, %v445_v24  ;;  %v938_v24 = vld [vmem:[%s2674_s12 + $0x30] sm:$0xff] }
 0x321   :  { %v2135_v26 = vpack.c.bf16 %v939_v25, %v938_v24 }
 0x3ec   :  { %v1943_v32 = vpop.f32.mrb[0].mxu0 }
 0x3ed   :  { %v543_v33 = vadd.f32 %v1943_v32, %v1775_v31  ;;  %v537_v34 = vpop.f32.mrb[1].mxu0  ;;  %v944_v32 = vld [vmem:[%s2674_s12 + $0x60] sm:$0xff] }
 0x3ee   :  { %v538_v35 = vadd.f32 %v1775_v31, %v537_v34  ;;  %v945_v34 = vld [vmem:[%s2674_s12 + $0x68] sm:$0xff] }
 0x3ef   :  { %v557_v37 = vmax.f32 %v543_v33, 0.0 }
 0x3f0   :  { %v556_v36 = vmax.f32 %v538_v35, 0.0  ;;  %v2147_v35 = vpack.c.bf16 %v945_v34, %v944_v32 }
 0x3f2   :  { %1955 = vmatprep.mubr.msk.f32.mxu1 %vm222_vm4, %v556_v36  ;;  %v946_v36 = vld [vmem:[%s2674_s12 + $0x70] sm:$0xff] }
 0x3f3   :  { %v1946_v38 = vpop.f32.mrb[2].mxu0  ;;  %1956 = vmatmul.mubr.msk.f32.vlgmr.msra.gmra.mrb[8].mxu1 %vm222_vm4, %v557_v37  ;;  %v947_v37 = vld [vmem:[%s2674_s12 + $0x78] sm:$0xff] }
 0x3f4   :  { %v553_v39 = vadd.f32 %v1946_v38, %v1775_v31  ;;  %v547_v40 = vpop.f32.mrb[3].mxu0  ;;  %2118 = vmatpush3.bf16.msra.mxu1 %v2115_v49  ;;  %v2151_v38 = vpack.c.bf16 %v947_v37, %v946_v36  ;;  %v1096_v49 = vcombine.low %v1085_v47, %v1079_v48  ;;  %v2258_v36 = vmov 0.0|0.0  }
 0x3f5   :  { %v548_v41 = vadd.f32 %v1775_v31, %v547_v40  ;;  %2120 = vmatprep.subr.bf16.mxu1 %v2119_v1  ;;  %v943_v31 = vld [vmem:[%s2674_s12 + $0x58] sm:$0xff]  ;;  %v1076_v40 = vld [vmem:[%s2696_s24] sm:$0xff] }
 0x3f6   :  { %v559_v43 = vmax.f32 %v553_v39, 0.0  ;;  %v2143_v33 = vpack.c.bf16 %v943_v31, %v942_v30  ;;  %v1086_v39 = vld [vmem:[%s2678_s16] sm:$0x7] }
 0x3f7   :  { %v558_v42 = vmax.f32 %v548_v41, 0.0  ;;  %v2256_v41 = vmov 0.0   ;;  %v1806_v31 = vld [vmem:[%s2679_s17] ss:$0 sm:$0xff] }
 0x3f8   :  { %2122 = vmatpush3.bf16.msra.mxu1 %v2119_v1 }
 0x3f9   :  { %1958 = vmatprep.mubr.msk.f32.mxu1 %vm222_vm4, %v558_v42  ;;  %2027 = vmatprep.subr.mxu1 %v2256_v41  ;;  %v1084_v42 = vcombine.high %v1076_v40, %v1076_v40 }
 0x3fa   :  { %1959 = vmatmul.mubr.msk.f32.gmra.mrb[10].mxu1 %vm222_vm4, %v559_v43  ;;  %v1077_v43 = vld [vmem:[%s2696_s24 + $0x8] sm:$0xf] }
 0x3fb   :  { %v1094_v45 = vcombine.low %v1076_v40, %v1084_v42  ;;  %v1095_v46 = vcombine.low %v1077_v43, %v1078_v44 }
 0x4c6   :  { %v1957_v51 = vpop.f32.mrb[8].mxu1 }
 0x4c7   :  { %v657_v52 = vadd.f32 %v1957_v51, %v1785_v50  ;;  %v651_v53 = vpop.f32.mrb[9].mxu1 }
 0x4c8   :  { %v652_v54 = vadd.f32 %v1785_v50, %v651_v53 }
 0x4c9   :  { %v671_v56 = vmax.f32 %v657_v52, 0.0 }
 0x4ca   :  { %v670_v55 = vmax.f32 %v652_v54, 0.0 }
 0x4cc   :  { %1969 = vmatprep.mubr.msk.f32.mxu0 %vm222_vm4, %v670_v55 }
 0x4cd   :  { %v1960_v57 = vpop.f32.mrb[10].mxu1  ;;  %1970 = vmatmul.mubr.msk.f32.vlgmr.msra.gmra.mrb[4].mxu0 %vm222_vm4, %v671_v56 }
 0x4ce   :  { %v667_v58 = vadd.f32 %v1960_v57, %v1785_v50  ;;  %v661_v59 = vpop.f32.mrb[11].mxu1  ;;  %2126 = vmatpush3.bf16.msra.mxu0 %v2123_v4 }
 0x4cf   :  { %v662_v60 = vadd.f32 %v1785_v50, %v661_v59  ;;  %2128 = vmatprep.subr.bf16.mxu0 %v2127_v20  ;;  %v1800_v50 = vld [vmem:[%s2673_s11] ss:$0 sm:$0xff] }
 0x4d0   :  { %v673_v62 = vmax.f32 %v667_v58, 0.0 }
 0x4d1   :  { %v672_v61 = vmax.f32 %v662_v60, 0.0 }
 0x4d2   :  { %2130 = vmatpush3.bf16.msra.mxu0 %v2127_v20 }
 0x4d3   :  { %1972 = vmatprep.mubr.msk.f32.mxu0 %vm222_vm4, %v672_v61  ;;  %2132 = vmatprep.subr.bf16.mxu0 %v2131_v23 }
 0x4d4   :  { %1973 = vmatmul.mubr.msk.f32.gmra.mrb[6].mxu0 %vm222_vm4, %v673_v62 }
 0x4d6   :  { %2134 = vmatpush3.bf16.msra.mxu0 %v2131_v23 }
 0x4d7   :  { %2136 = vmatprep.subr.bf16.mxu0 %v2135_v26 }
 0x4da   :  { %2138 = vmatpush3.bf16.msra.mxu0 %v2135_v26 }
 0x4db   :  { %2140 = vmatprep.subr.bf16.mxu0 %v2139_v29 }
 0x4de   :  { %2142 = vmatpush3.bf16.msra.mxu0 %v2139_v29 }
 0x4df   :  { %2144 = vmatprep.subr.bf16.mxu0 %v2143_v33 }
 0x4e2   :  { %2146 = vmatpush3.bf16.msra.mxu0 %v2143_v33  ;;  %v1215_v33 = vld [vmem:[%s2680_s18] sm:$0xff] }
 0x4e3   :  { %2148 = vmatprep.subr.bf16.mxu0 %v2147_v35 }
 0x4e6   :  { %2150 = vmatpush3.bf16.msra.mxu0 %v2147_v35 }
 0x4e7   :  { %2152 = vmatprep.subr.bf16.mxu0 %v2151_v38 }
 0x4ea   :  { %2154 = vmatpush3.bf16.msra.mxu0 %v2151_v38 }
 0x4eb   :  { %2158 = vmatprep.subr.bf16.mxu0 %v2258_v36 }
 0x5a0   :  { %v1971_v6 = vpop.f32.mrb[4].mxu0 }
 0x5a1   :  { %v771_v7 = vadd.f32 %v1971_v6, %v1795_v5  ;;  %v765_v8 = vpop.f32.mrb[5].mxu0 }
 0x5a2   :  { %v766_v9 = vadd.f32 %v1795_v5, %v765_v8 }
 0x5a3   :  { %v785_v11 = vmax.f32 %v771_v7, 0.0 }
 0x5a4   :  { %v784_v10 = vmax.f32 %v766_v9, 0.0 }
 0x5a6   :  { %1983 = vmatprep.mubr.msk.f32.mxu1 %vm222_vm4, %v784_v10 }
 0x5a7   :  { %v1974_v12 = vpop.f32.mrb[6].mxu0  ;;  %1984 = vmatmul.mubr.msk.f32.vlgmr.msra.gmra.mrb[12].mxu1 %vm222_vm4, %v785_v11 }
 0x5a8   :  { %v781_v13 = vadd.f32 %v1974_v12, %v1795_v5  ;;  %v775_v14 = vpop.f32.mrb[7].mxu0  ;;  %2028 = vmatpush3.msk.msra.mxu1 %vm1104_vm5, %v1086_v39 }
 0x5a9   :  { %v776_v15 = vadd.f32 %v1795_v5, %v775_v14  ;;  %2038 = vmatprep.subr.mxu1 %v2256_v41 }
 0x5aa   :  { %v787_v17 = vmax.f32 %v781_v13, 0.0 }
 0x5ab   :  { %v786_v16 = vmax.f32 %v776_v15, 0.0 }
 0x5ad   :  { %1986 = vmatprep.mubr.msk.f32.mxu1 %vm222_vm4, %v786_v16 }
 0x5ae   :  { %1987 = vmatmul.mubr.msk.f32.gmra.mrb[14].mxu1 %vm222_vm4, %v787_v17 }
 0x5af   :  { %2029 = vmatprep.mubr.msk.f32.mxu1 %vm2257_vm6, %v2256_v41 }
 0x5b2   :  { %2030 = vmatmul.mubr.msk.f32.vlgmr.msra.gmra.mrb[16].mxu1 %vm1097_vm7, %v1094_v45 }
 0x5b3   :  { %2032 = vmatprep.mubr.msk.f32.mxu1 %vm2257_vm6, %v2256_v41  ;;  %2039 = vmatpush3.msra.mxu1 %v1215_v33 }
 0x5b4   :  { %2155 = vmatprep.subr.bf16.mxu1 %v2258_v36 }
 0x5b6   :  { %2033 = vmatmul.mubr.msk.f32.gmra.mrb[18].mxu1 %vm1097_vm7, %v1095_v46 }
 0x5b7   :  { %2035 = vmatprep.mubr.msk.f32.mxu1 %vm2257_vm6, %v2256_v41 }
 0x5ba   :  { %2036 = vmatmul.mubr.msk.f32.gmra.mrb[20].mxu1 %vm1097_vm7, %v1096_v49 }
 0x5bb   :  { %2040 = vmatprep.mubr.msk.f32.mxu1 %vm2257_vm6, %v2256_v41 }
 0x67a   :  { %v1985_v51 = vpop.f32.mrb[12].mxu1 }
 0x67b   :  { %v883_v52 = vadd.f32 %v1985_v51, %v1800_v50  ;;  %v877_v53 = vpop.f32.mrb[13].mxu1 }
 0x67c   :  { %v878_v54 = vadd.f32 %v1800_v50, %v877_v53 }
 0x67d   :  { %v901_v55 = vmul.f32 0.044715, %v883_v52  ;;  %v897_v20 = vmul.f32 0.5, %v883_v52 }
 0x67e   :  { %v900_v56 = vmul.f32 0.044715, %v878_v54  ;;  %v896_v18 = vmul.f32 0.5, %v878_v54 }
 0x67f   :  { %v905_v57 = vmul.f32 %v901_v55, %v883_v52 }
 0x680   :  { %v904_v58 = vmul.f32 %v900_v56, %v878_v54 }
 0x681   :  { %v909_v59 = vmul.f32 %v905_v57, %v883_v52  ;;  %v1988_v60 = vpop.f32.mrb[14].mxu1 }
 0x682   :  { %v893_v61 = vadd.f32 %v1988_v60, %v1800_v50  ;;  %v887_v62 = vpop.f32.mrb[15].mxu1  ;;  %v908_v63 = vmul.f32 %v904_v58, %v878_v54  ;;  %v1340_v60 = vld [vmem:[%s2676_s14] sm:$0xff] }
 0x683   :  { %v913_v0 = vadd.f32 %v909_v59, %v883_v52  ;;  %v888_v1 = vadd.f32 %v1800_v50, %v887_v62 }
 0x684   :  { %v903_v2 = vmul.f32 0.044715, %v893_v61  ;;  %v912_v3 = vadd.f32 %v908_v63, %v878_v54  ;;  %v899_v28 = vmul.f32 0.5, %v893_v61 }
 0x685   :  { %v917_v4 = vmul.f32 0.7978846, %v913_v0  ;;  %v902_v5 = vmul.f32 0.044715, %v888_v1  ;;  %v898_v26 = vmul.f32 0.5, %v888_v1  ;;  %v1174_v32 = vpop.f32.mrb[16].mxu1 }
 0x686   :  { %v907_v6 = vmul.f32 %v903_v2, %v893_v61  ;;  %v916_v7 = vmul.f32 0.7978846, %v912_v3  ;;  %v1175_v34 = vadd.f32 %v1806_v31, %v1174_v32  ;;  %v2031_v35 = vpop.f32.mrb[17].mxu1 }
 0x687   :  { %2198 = vtanh.f32 %v917_v4  ;;  %v906_v8 = vmul.f32 %v902_v5, %v888_v1 }
 0x688   :  { %2200 = vtanh.f32 %v916_v7  ;;  %v911_v9 = vmul.f32 %v907_v6, %v893_v61  ;;  %v1191_v38 = vmul.f32 0.044715, %v1175_v34  ;;  %v1188_v59 = vmul.f32 0.5, %v1175_v34 }
 0x689   :  { %v910_v10 = vmul.f32 %v906_v8, %v888_v1  ;;  %v1179_v37 = vpop.f32.mrb[18].mxu1 }
 0x68a   :  { %v915_v11 = vadd.f32 %v911_v9, %v893_v61  ;;  %v1180_v39 = vadd.f32 %v1806_v31, %v1179_v37  ;;  %v2034_v40 = vpop.f32.mrb[19].mxu1  ;;  %v1194_v43 = vmul.f32 %v1191_v38, %v1175_v34  ;;  %v1341_v61 = vld [vmem:[%s2676_s14 + $0x8] sm:$0xff] }
 0x68b   :  { %v914_v12 = vadd.f32 %v910_v10, %v888_v1  ;;  %v2608_v2 = vpack.c.bf16 %v1341_v61, %v1340_v60  ;;  %v1805_v10 = vld [vmem:[#allocation2] ss:$0 sm:$0xff] }
 0x68c   :  { %v919_v13 = vmul.f32 0.7978846, %v915_v11  ;;  %v1192_v44 = vmul.f32 0.044715, %v1180_v39  ;;  %v1197_v47 = vmul.f32 %v1194_v43, %v1175_v34  ;;  %v1189_v0 = vmul.f32 0.5, %v1180_v39 }
 0x68d   :  { %v918_v14 = vmul.f32 0.7978846, %v914_v12  ;;  %v1184_v42 = vpop.f32.mrb[20].mxu1 }
 0x68e   :  { %2202 = vtanh.f32 %v919_v13  ;;  %v1185_v45 = vadd.f32 %v1806_v31, %v1184_v42  ;;  %v2037_v46 = vpop.f32.mrb[21].mxu1  ;;  %v1195_v48 = vmul.f32 %v1192_v44, %v1180_v39  ;;  %v1200_v50 = vadd.f32 %v1197_v47, %v1175_v34 }
 0x68f   :  { %2204 = vtanh.f32 %v918_v14 }
 0x690   :  { %v1193_v49 = vmul.f32 0.044715, %v1185_v45  ;;  %v1198_v51 = vmul.f32 %v1195_v48, %v1180_v39  ;;  %v1203_v53 = vmul.f32 0.7978846, %v1200_v50  ;;  %v1190_v7 = vmul.f32 0.5, %v1185_v45 }
 0x691   :  { %v2199_v15 = vpop.eup %2198 }
 0x692   :  { %v2201_v16 = vpop.eup %2200  ;;  %v925_v17 = vadd.f32 1.0, %v2199_v15  ;;  %v1196_v52 = vmul.f32 %v1193_v49, %v1185_v45  ;;  %v1201_v54 = vadd.f32 %v1198_v51, %v1180_v39  ;;  %2206 = vtanh.f32 %v1203_v53 }
 0x693   :  { %v924_v19 = vadd.f32 1.0, %v2201_v16 }
 0x694   :  { %v929_v22 = vmul.f32 %v925_v17, %v897_v20  ;;  %v1199_v55 = vmul.f32 %v1196_v52, %v1185_v45  ;;  %v1204_v57 = vmul.f32 0.7978846, %v1201_v54 }
 0x695   :  { %v928_v21 = vmul.f32 %v924_v19, %v896_v18 }
 0x696   :  { %v1202_v56 = vadd.f32 %v1199_v55, %v1185_v45  ;;  %2208 = vtanh.f32 %v1204_v57  ;;  %v1811_v57 = vld [vmem:[%s2681_s19] ss:$0 sm:$0xff] }
 0x697   :  { %2021 = vmatprep.mubr.f32.mxu0 %v928_v21 }
 0x698   :  { %v2203_v23 = vpop.eup %2202  ;;  %2022 = vmatmul.mubr.f32.vlgmr.msra.gmra.mrb[8].mxu0 %v929_v22  ;;  %v1205_v58 = vmul.f32 0.7978846, %v1202_v56 }
 0x699   :  { %v2205_v24 = vpop.eup %2204  ;;  %v927_v25 = vadd.f32 1.0, %v2203_v23 }
 0x69a   :  { %v926_v27 = vadd.f32 1.0, %v2205_v24  ;;  %2210 = vtanh.f32 %v1205_v58 }
 0x69b   :  { %v931_v30 = vmul.f32 %v927_v25, %v899_v28 }
 0x69c   :  { %v930_v29 = vmul.f32 %v926_v27, %v898_v26  ;;  %v2207_v62 = vpop.eup %2206 }
 0x69d   :  { %v1209_v63 = vadd.f32 1.0, %v2207_v62 }
 0x69e   :  { %2024 = vmatprep.mubr.f32.mxu0 %v930_v29 }
 0x69f   :  { %2025 = vmatmul.mubr.f32.gmra.mrb[10].mxu0 %v931_v30  ;;  %v1212_v3 = vmul.f32 %v1209_v63, %v1188_v59 }
 0x6a0   :  { %2060 = vmatprep.mubr.msk.f32.mxu0 %vm2257_vm6, %v2256_v41  ;;  %v2209_v1 = vpop.eup %2208 }
 0x6a1   :  { %v1210_v4 = vadd.f32 1.0, %v2209_v1  ;;  %2041 = vmatmul.mubr.msk.f32.vlgmr.msra.gmra.mrb[22].mxu1 %vm1223_vm8, %v1212_v3 }
 0x6a2   :  { %2043 = vmatprep.mubr.msk.f32.mxu1 %vm2257_vm6, %v2256_v41  ;;  %2157 = vmatpush3.bf16.msra.mxu1 %v2608_v2 }
 0x6a3   :  { %v1213_v6 = vmul.f32 %v1210_v4, %v1189_v0  ;;  %2162 = vmatprep.subr.bf16.mxu1 %v2258_v36 }
 0x6a4   :  { %v2211_v5 = vpop.eup %2210 }
 0x6a5   :  { %v1211_v8 = vadd.f32 1.0, %v2211_v5  ;;  %2044 = vmatmul.mubr.msk.f32.gmra.mrb[24].mxu1 %vm1223_vm8, %v1213_v6 }
 0x6a6   :  { %2046 = vmatprep.mubr.msk.f32.mxu1 %vm2257_vm6, %v2256_v41 }
 0x6a7   :  { %v1214_v9 = vmul.f32 %v1211_v8, %v1190_v7 }
 0x6a9   :  { %2047 = vmatmul.mubr.msk.f32.gmra.mrb[26].mxu1 %vm1223_vm8, %v1214_v9 }
 0x6aa   :  { %2053 = vmatprep.mubr.msk.f32.mxu1 %vm2257_vm6, %v2256_v41 }
 0x76b   :  { %v2023_v11 = vpop.f32.mrb[8].mxu0 }
 0x76c   :  { %v1027_v12 = vadd.f32 %v2023_v11, %v1805_v10  ;;  %v1021_v13 = vpop.f32.mrb[9].mxu0 }
 0x76d   :  { %v1022_v14 = vadd.f32 %v1805_v10, %v1021_v13 }
 0x76e   :  { %v1045_v15 = vmul.f32 0.044715, %v1027_v12  ;;  %v1041_v47 = vmul.f32 0.5, %v1027_v12 }
 0x76f   :  { %v1044_v16 = vmul.f32 0.044715, %v1022_v14  ;;  %v1040_v43 = vmul.f32 0.5, %v1022_v14 }
 0x770   :  { %v1049_v17 = vmul.f32 %v1045_v15, %v1027_v12 }
 0x771   :  { %v1048_v18 = vmul.f32 %v1044_v16, %v1022_v14 }
 0x772   :  { %v1053_v19 = vmul.f32 %v1049_v17, %v1027_v12  ;;  %v2026_v20 = vpop.f32.mrb[10].mxu0 }
 0x773   :  { %v1037_v21 = vadd.f32 %v2026_v20, %v1805_v10  ;;  %v1031_v22 = vpop.f32.mrb[11].mxu0  ;;  %v1052_v23 = vmul.f32 %v1048_v18, %v1022_v14 }
 0x774   :  { %v1057_v24 = vadd.f32 %v1053_v19, %v1027_v12  ;;  %v1032_v25 = vadd.f32 %v1805_v10, %v1031_v22  ;;  %v1299_v58 = vpop.f32.mrb[22].mxu1 }
 0x775   :  { %v1047_v26 = vmul.f32 0.044715, %v1037_v21  ;;  %v1056_v27 = vadd.f32 %v1052_v23, %v1022_v14  ;;  %v1043_v55 = vmul.f32 0.5, %v1037_v21  ;;  %v1300_v59 = vadd.f32 %v1811_v57, %v1299_v58  ;;  %v2042_v60 = vpop.f32.mrb[23].mxu1 }
 0x776   :  { %v1046_v28 = vmul.f32 0.044715, %v1032_v25  ;;  %v1061_v29 = vmul.f32 0.7978846, %v1057_v24  ;;  %v1042_v51 = vmul.f32 0.5, %v1032_v25 }
 0x777   :  { %v1051_v30 = vmul.f32 %v1047_v26, %v1037_v21  ;;  %v1060_v31 = vmul.f32 0.7978846, %v1056_v27  ;;  %v1316_v61 = vmul.f32 0.044715, %v1300_v59  ;;  %v1313_v17 = vmul.f32 0.5, %v1300_v59 }
 0x778   :  { %v1050_v32 = vmul.f32 %v1046_v28, %v1032_v25  ;;  %2212 = vtanh.f32 %v1061_v29  ;;  %v1304_v62 = vpop.f32.mrb[24].mxu1 }
 0x779   :  { %v1055_v33 = vmul.f32 %v1051_v30, %v1037_v21  ;;  %2214 = vtanh.f32 %v1060_v31  ;;  %v1319_v63 = vmul.f32 %v1316_v61, %v1300_v59  ;;  %v1305_v0 = vadd.f32 %v1811_v57, %v1304_v62  ;;  %v2045_v1 = vpop.f32.mrb[25].mxu1 }
 0x77a   :  { %v1054_v34 = vmul.f32 %v1050_v32, %v1032_v25 }
 0x77b   :  { %v1059_v35 = vadd.f32 %v1055_v33, %v1037_v21  ;;  %v1322_v4 = vmul.f32 %v1319_v63, %v1300_v59  ;;  %v1317_v5 = vmul.f32 0.044715, %v1305_v0  ;;  %v1314_v18 = vmul.f32 0.5, %v1305_v0 }
 0x77c   :  { %v1058_v37 = vadd.f32 %v1054_v34, %v1032_v25  ;;  %v1309_v6 = vpop.f32.mrb[26].mxu1 }
 0x77d   :  { %v1063_v38 = vmul.f32 0.7978846, %v1059_v35  ;;  %v1325_v7 = vadd.f32 %v1322_v4, %v1300_v59  ;;  %v1320_v8 = vmul.f32 %v1317_v5, %v1305_v0  ;;  %v1310_v9 = vadd.f32 %v1811_v57, %v1309_v6  ;;  %v2048_v10 = vpop.f32.mrb[27].mxu1 }
 0x77e   :  { %v1062_v39 = vmul.f32 0.7978846, %v1058_v37 }
 0x77f   :  { %2216 = vtanh.f32 %v1063_v38  ;;  %v1328_v11 = vmul.f32 0.7978846, %v1325_v7  ;;  %v1323_v12 = vmul.f32 %v1320_v8, %v1305_v0  ;;  %v1318_v22 = vmul.f32 0.044715, %v1310_v9 }
 0x780   :  { %2218 = vtanh.f32 %v1062_v39  ;;  %v1315_v31 = vmul.f32 0.5, %v1310_v9  ;;  %v1342_v39 = vld [vmem:[%s2677_s15] sm:$0x1] }
 0x781   :  { %2220 = vtanh.f32 %v1328_v11  ;;  %v1326_v14 = vadd.f32 %v1323_v12, %v1305_v0  ;;  %v1321_v26 = vmul.f32 %v1318_v22, %v1310_v9 }
 0x782   :  { %v2213_v40 = vpop.eup %2212 }
 0x783   :  { %v2215_v42 = vpop.eup %2214  ;;  %v1069_v46 = vadd.f32 1.0, %v2213_v40  ;;  %v1329_v15 = vmul.f32 0.7978846, %v1326_v14  ;;  %v1324_v27 = vmul.f32 %v1321_v26, %v1310_v9 }
 0x784   :  { %v1068_v44 = vadd.f32 1.0, %v2215_v42 }
 0x785   :  { %v1073_v50 = vmul.f32 %v1069_v46, %v1041_v47  ;;  %2222 = vtanh.f32 %v1329_v15  ;;  %v1327_v28 = vadd.f32 %v1324_v27, %v1310_v9 }
 0x786   :  { %v1072_v45 = vmul.f32 %v1068_v44, %v1040_v43 }
 0x787   :  { %v1330_v29 = vmul.f32 0.7978846, %v1327_v28 }
 0x788   :  { %1343 = vxpose.xlu1.b32.start [1/2] (short) (narrow) %v1072_v45, 8  ;;  %v1541_v45 = vld [vmem:[%s2677_s15] sm:$0x1]  ;;  %s2259_s15 = smov [#allocation3]  }
 0x789   :  { %v2217_v48 = vpop.eup %2216  ;;  %2224 = vtanh.f32 %v1330_v29  ;;  %s1745_s5 = sshll.u32 %s2259_s15, 4  ;;  %s1746_s5 = int_to_ptr.vmem [resolvable:$true] %s1745_s5 }
 0x78a   :  { %v2219_v49 = vpop.eup %2218  ;;  %v1071_v54 = vadd.f32 1.0, %v2217_v48  ;;  %s2230_s28 = scalar_lea.vmem %s1746_s5, 32  ;;  %p2235_p1 = scmp.lt.s32.totalorder %s1746_s5, %s1746_s5 }
 0x78b   :  { %v1070_v52 = vadd.f32 1.0, %v2219_v49  ;;  %v2221_v16 = vpop.eup %2220  ;;  %p2231_p0 = scmp.ne.s32.totalorder %s1746_s5, %s2230_s28  ;;  %p2236_p2 = scmp.lt.s32.totalorder %s2230_s28, %s2230_s28 }
 0x78c   :  { %1344 = vxpose.xlu1.b32.end [2/2] (short) (narrow) %v1073_v50, 8  ;;  %v1075_v56 = vmul.f32 %v1071_v54, %v1043_v55 }
 0x78d   :  { %v1074_v53 = vmul.f32 %v1070_v52, %v1042_v51  ;;  %p2237_p3 = por %p2236_p2, %p2235_p1 }
 0x78f   :  { %1542 = vxpose.xlu0.b32.start [1/2] (short) (narrow) %v1074_v53, 8  ;;  %v2223_v19 = vpop.eup %2222  ;;  %p2238_p4 = pnand %p2237_p3, %p2231_p0 }
 0x790   :  { %v1335_v20 = vadd.f32 1.0, %v2223_v19 }
 0x792   :  { %v1338_v23 = vmul.f32 %v1335_v20, %v1314_v18 }
 0x793   :  { %1543 = vxpose.xlu0.b32.end [2/2] (short) (narrow) %v1075_v56, 8  ;;  %v2225_v30 = vpop.eup %2224 }
 0x794   :  { %v1336_v32 = vadd.f32 1.0, %v2225_v30  ;;  %v1658_v33 = vrot.slane %v1338_v23, 4 }
 0x796   :  { %v1339_v34 = vmul.f32 %v1336_v32, %v1315_v31 }
 0x798   :  { %v1659_v35 = vrot.slane %v1339_v34, 4 }
 0x79a   :  { %v1660_v37 = vsel %vm1657_vm11, %v1658_v33, %v1659_v35 }
 0x79b   :  { %v2166_v38 = vpack.c.bf16 %v1659_v35, %v1660_v37 }
 0x808   :  { %v1359_v3 = vpop.trf.xlu1 }
 0x809   :  { %2054 = vmatmul.mubr.msk.f32.vlgmr.msra.gmra.mrb[28].mxu1 %vm1375_vm9, %v1359_v3 }
 0x80a   :  { %2164 = vmatpush3.bf16.msra.mxu1 %v2608_v2  ;;  %2067 = vmatprep.mubr.msk.f32.mxu1 %vm2257_vm6, %v2256_v41  ;;  %v1334_v2 = vadd.f32 1.0, %v2221_v16 }
 0x80c   :  { %v1337_v21 = vmul.f32 %v1334_v2, %v1313_v17 }
 0x80e   :  { %v2159_v25 = vpack.c.bf16 %v1338_v23, %v1337_v21 }
 0x80f   :  { %v1558_v13 = vpop.trf.xlu0 }
 0x810   :  { %2068 = vmatmul.mubr.msk.f32.vlgmr.msra.gmra.mrb[30].mxu1 %vm1375_vm9, %v1558_v13  ;;  %2161 = vmatpush3.bf16.xpose.msk.msra.mxu0 %vm2631_vm10, %v2159_v25 }
 0x811   :  { %2165 = vmatprep.subr.bf16.mxu0 %v2258_v36 }
 0x8dc   :  { %v1445_v40 = vpop.f32.mrb[28].mxu1 }
 0x8dd   :  { %v1446_v42 = vadd.f32 %v1445_v40, %v1342_v39  ;;  %v2055_v36 = vpop.f32.mrb[29].mxu1 }
 0x8df   :  { %v1450_v43 = vmul.f32 0.044715, %v1446_v42  ;;  %v1449_v58 = vmul.f32 0.5, %v1446_v42 }
 0x8e1   :  { %v1451_v44 = vmul.f32 %v1450_v43, %v1446_v42 }
 0x8e3   :  { %v1452_v46 = vmul.f32 %v1451_v44, %v1446_v42  ;;  %v1643_v47 = vpop.f32.mrb[30].mxu1 }
 0x8e4   :  { %v1644_v48 = vadd.f32 %v1643_v47, %v1541_v45  ;;  %v2069_v49 = vpop.f32.mrb[31].mxu1 }
 0x8e5   :  { %v1453_v50 = vadd.f32 %v1452_v46, %v1446_v42 }
 0x8e6   :  { %v1648_v51 = vmul.f32 0.044715, %v1644_v48  ;;  %v1647_v62 = vmul.f32 0.5, %v1644_v48 }
 0x8e7   :  { %v1454_v52 = vmul.f32 0.7978846, %v1453_v50 }
 0x8e8   :  { %v1649_v53 = vmul.f32 %v1648_v51, %v1644_v48 }
 0x8e9   :  { %2226 = vtanh.f32 %v1454_v52 }
 0x8ea   :  { %v1650_v54 = vmul.f32 %v1649_v53, %v1644_v48 }
 0x8ec   :  { %v1651_v55 = vadd.f32 %v1650_v54, %v1644_v48 }
 0x8ee   :  { %v1652_v56 = vmul.f32 0.7978846, %v1651_v55 }
 0x8f0   :  { %2228 = vtanh.f32 %v1652_v56 }
 0x8f3   :  { %v2227_v57 = vpop.eup %2226 }
 0x8f4   :  { %v1456_v59 = vadd.f32 1.0, %v2227_v57 }
 0x8f6   :  { %v1457_v60 = vmul.f32 %v1456_v59, %v1449_v58 }
 0x8f8   :  { %2061 = vmatmul.mubr.msk.f32.vlgmr.msra.gmra.mrb[12].mxu0 %vm1223_vm8, %v1457_v60 }
 0x8f9   :  { %2168 = vmatpush3.bf16.xpose.msk.msra.mxu0 %vm2631_vm10, %v2166_v38  ;;  %2074 = vmatprep.mubr.msk.f32.mxu0 %vm2257_vm6, %v2256_v41 }
 0x8fa   :  { %v2229_v61 = vpop.eup %2228 }
 0x8fb   :  { %v1654_v63 = vadd.f32 1.0, %v2229_v61 }
 0x8fd   :  { %v1655_v0 = vmul.f32 %v1654_v63, %v1647_v62 }
 0x900   :  { %2075 = vmatmul.mubr.msk.f32.vlgmr.msra.gmra.mrb[14].mxu0 %vm1223_vm8, %v1655_v0 }
 0x9cb   :  { %v1533_v1 = vpop.f32.mrb[12].mxu0 }
 0x9cc   :  { %1538 = vst.msk [vmem:[#allocation3] sm:$0x1] %vm1537_vm12, %v1533_v1  ;;  %v2062_v3 = vpop.f32.mrb[13].mxu0 }
 0x9d3   :  { %v1734_v4 = vpop.f32.mrb[14].mxu0 }
 0x9d4   :  { %1739 = vst.msk [vmem:[#allocation3 + $0x1] sm:$0x1] %vm1537_vm12, %v1734_v4  ;;  %v2076_v5 = vpop.f32.mrb[15].mxu0 }
 0x9d5   :  { %2241 = shalt.err (!%p2238_p4)
}
 0x9d6   :  { %s2242_s22 = scalar_lea.hbm %s2682_s20, 32 }
 0x9d7   :  { %p2243_p5 = scmp.ne.s32.totalorder %s2682_s20, %s2242_s22  ;;  %p2246_p6 = scmp.lt.u32.totalorder %s2242_s22, %s2682_s20 }
 0x9d9   :  { %p2248_p7 = pnand %p2246_p6, %p2243_p5 }
 0x9db   :  { %2251 = shalt.err (!%p2248_p7)
}
 0x9dc   :  { %s2260_s16 = smov 16   ;;  %s2261_s8 = smov 1  }
 0x9dd   :  { %1751 = dma.vmem_to_hbm [thread:$0]  %s1746_s5, 32, %s2682_s20, [#allocation4], %s2260_s16, %s2260_s16, %s2261_s8  }
 0x9de   :  { %2252 = dma.done.wait [#allocation4], 32  }
 0x9df   :  { %2253 = vsyncadd [#allocation4], 4294967264 }
 0x9e0   :  { %1755 = vsyncpa [#allocation4], 1 }

</bundles_post_ra>
